<compile_context>
chip_gen: v6e
topology: v6e:2x2x1
jax: 0.10.0
libtpu: 0.0.40
codegen_flags: <defaults>
</compile_context>

<pallas_src>
import functools

import jax
import jax.numpy as jnp
from jax.experimental import pallas as pl
from jax.experimental.pallas import tpu as pltpu

BN_EPS = 1e-5                      # nn.BatchNorm2d default


def _device_has_big_vmem():
    """v5e/v5p/v6e have 128 MiB VMEM per core; default conservatively (fits v7x's 64 MiB)."""
    try:
        kind = jax.devices()[0].device_kind.lower()
    except Exception:
        return False
    return ("v5" in kind) or ("v6" in kind)


_BIG_VMEM = _device_has_big_vmem()
_VMEM_LIMIT = (96 if _BIG_VMEM else 48) * 1024 * 1024
_MATMUL_TILE_M = 1024 if _BIG_VMEM else 512      # rows per MXU tile
_APPLY_TILE_M = 2048 if _BIG_VMEM else 1024      # rows per element-wise epilogue tile

VMEM_SPEC = pl.BlockSpec(memory_space=pltpu.MemorySpace.VMEM)


def _cparams(grid_len):
    if grid_len:
        return pltpu.CompilerParams(
            dimension_semantics=("parallel",) * grid_len,
            vmem_limit_bytes=_VMEM_LIMIT)
    return pltpu.CompilerParams(vmem_limit_bytes=_VMEM_LIMIT)


def _round_up(x, m):
    return ((x + m - 1) // m) * m


def _row_tile(m, max_tile):
    """Fixed row tile (multiple of 8), cdiv grid handles the ragged remainder."""
    return min(max_tile, _round_up(m, 8))


# ----------------------------- Pallas kernels -----------------------------

def _matmul_stats_kernel(x_ref, w_ref, z_ref, s_ref, *, rows):
    """bf16 {0,1} acts x bf16 {-1,0,+1} weight signs -> exact f32 MXU accumulation.
    Emits z as int16 (exact integer counts) plus per-tile column sum / sum-of-squares
    for the global (training-mode) BN stats.  Rows past `rows` (ragged last tile) are masked."""
    z = jnp.dot(x_ref[...], w_ref[...], preferred_element_type=jnp.float32)
    tm = z.shape[0]
    row = pl.program_id(0) * tm + jax.lax.broadcasted_iota(jnp.int32, z.shape, 0)
    zm = jnp.where(row < rows, z, 0.0)
    z_ref[...] = zm.astype(jnp.int16)
    s_ref[0, 0:1, :] = jnp.sum(zm, axis=0, keepdims=True)
    s_ref[0, 1:2, :] = jnp.sum(zm * zm, axis=0, keepdims=True)


def _affine_q_kernel(z_ref, a_ref, q_ref):
    """BN epilogue, quantized-only output: q = round(clip(z*scale + shift, 0, 1)) in bf16.
    (clip(y,0,1) == clip(relu(y),0,1), so the ReLU is absorbed.)  a_ref rows: [scale; shift]."""
    y = z_ref[...].astype(jnp.float32) * a_ref[0:1, :] + a_ref[1:2, :]
    q_ref[...] = jnp.round(jnp.clip(y, 0.0, 1.0)).astype(jnp.bfloat16)


def _affine_qf_kernel(z_ref, a_ref, q_ref, y_ref):
    """BN + ReLU epilogue emitting both the quantized bf16 activation and the f32 activation."""
    y = z_ref[...].astype(jnp.float32) * a_ref[0:1, :] + a_ref[1:2, :]
    y = jnp.maximum(y, 0.0)
    q_ref[...] = jnp.round(jnp.clip(y, 0.0, 1.0)).astype(jnp.bfloat16)
    y_ref[...] = y


def _merge_q_kernel(z_ref, a_ref, r_ref, b_ref, q_ref):
    """Fused block merge: relu((z*sz+tz) + (r*sr+tr)) -> quantized bf16 only.
    Identity shortcuts pass r = f32 activation with scale 1 / shift 0; conv shortcuts pass
    their own int16 z and folded BN affine."""
    y = z_ref[...].astype(jnp.float32) * a_ref[0:1, :] + a_ref[1:2, :]
    s = r_ref[...].astype(jnp.float32) * b_ref[0:1, :] + b_ref[1:2, :]
    y = jnp.maximum(y + s, 0.0)
    q_ref[...] = jnp.round(jnp.clip(y, 0.0, 1.0)).astype(jnp.bfloat16)


def _merge_qf_kernel(z_ref, a_ref, r_ref, b_ref, q_ref, y_ref):
    """Fused block merge emitting both the quantized bf16 and the f32 activation."""
    y = z_ref[...].astype(jnp.float32) * a_ref[0:1, :] + a_ref[1:2, :]
    s = r_ref[...].astype(jnp.float32) * b_ref[0:1, :] + b_ref[1:2, :]
    y = jnp.maximum(y + s, 0.0)
    q_ref[...] = jnp.round(jnp.clip(y, 0.0, 1.0)).astype(jnp.bfloat16)
    y_ref[...] = y


def _pool_fc_kernel(x_ref, w_ref, b_ref, o_ref):
    """AdaptiveAvgPool2d(1) (in-kernel mean over H*W) + DoReFa-weight-quantized Linear."""
    pooled = jnp.mean(x_ref[...], axis=1)                                   # (N, C)
    o_ref[...] = jnp.dot(pooled, w_ref[...],
                         preferred_element_type=jnp.float32) + b_ref[...]


# ----------------------------- host-side glue ------------------------------

def _quantize_act(x):
    # DoReFa 1-bit activation quant: round(clip(a, 0, 1)); {0,1} is exact in bf16.
    return jnp.round(jnp.clip(x, 0.0, 1.0)).astype(jnp.bfloat16)


def _im2col(xq, kh, kw, stride, padding):
    N, H, W, Cin = xq.shape
    Ho = (H + 2 * padding - kh) // stride + 1
    Wo = (W + 2 * padding - kw) // stride + 1
    xp = jnp.pad(xq, ((0, 0), (padding, padding), (padding, padding), (0, 0)))
    cols = []
    for dh in range(kh):
        for dw in range(kw):
            cols.append(xp[:, dh:dh + (Ho - 1) * stride + 1:stride,
                              dw:dw + (Wo - 1) * stride + 1:stride, :])
    xcol = jnp.concatenate(cols, axis=-1).reshape(N * Ho * Wo, kh * kw * Cin)
    return xcol, Ho, Wo


def _conv_raw(xq_nhwc, w_oihw, *, stride, padding):
    """DoReFa conv as a row-tiled Pallas matmul on an already-quantized bf16 {0,1} activation.
    Returns the UNSCALED sign-matmul output z (M, Cout) int16 (exact counts), global column
    sum / sum-of-squares (f32), the scalar weight scale, and output dims."""
    Cout, Cin, kh, kw = w_oihw.shape
    N = xq_nhwc.shape[0]
    xcol, Ho, Wo = _im2col(xq_nhwc, kh, kw, stride, padding)
    M, K = xcol.shape

    s_w = jnp.mean(jnp.abs(w_oihw))                      # DoReFa 1-bit weight scale
    w_sign = jnp.sign(w_oihw).astype(jnp.bfloat16)       # {-1, 0, +1}: exact in bf16
    wmat = jnp.transpose(w_sign, (2, 3, 1, 0)).reshape(K, Cout)

    tm = _row_tile(M, _MATMUL_TILE_M)
    grid = (pl.cdiv(M, tm),)
    z, stats = pl.pallas_call(
        functools.partial(_matmul_stats_kernel, rows=M),
        out_shape=(jax.ShapeDtypeStruct((M, Cout), jnp.int16),
                   jax.ShapeDtypeStruct((grid[0], 2, Cout), jnp.float32)),
        grid=grid,
        in_specs=[pl.BlockSpec((tm, K), lambda i: (i, 0)),
                  pl.BlockSpec((K, Cout), lambda i: (0, 0))],      # weights resident
        out_specs=(pl.BlockSpec((tm, Cout), lambda i: (i, 0)),
                   pl.BlockSpec((1, 2, Cout), lambda i: (i, 0, 0))),
        compiler_params=_cparams(1),
    )(xcol, wmat)
    col_sum = jnp.sum(stats[:, 0, :], axis=0)
    col_sumsq = jnp.sum(stats[:, 1, :], axis=0)
    return z, col_sum, col_sumsq, s_w, (N, Ho, Wo, Cout)


def _bn_affine(col_sum, col_sumsq, n_rows, s_w, gamma, beta):
    """Fold DoReFa weight scale + training-mode BatchNorm (batch stats, biased var)
    into y = z*scale + shift."""
    mean = s_w * col_sum / n_rows
    ex2 = (s_w * s_w) * col_sumsq / n_rows
    var = jnp.maximum(ex2 - mean * mean, 0.0)
    inv = jax.lax.rsqrt(var + BN_EPS)
    scale = gamma * inv * s_w
    shift = beta - gamma * inv * mean
    return jnp.stack([scale, shift], axis=0)             # (2, C)


def _fold_factor(C, M):
    """Fold rows into lanes so the epilogue last dim is >=128 (lane-dense stores)."""
    if C < 128 and 128 % C == 0:
        f = 128 // C
        if M % f == 0:
            return f
    return 1


def _apply_affine(z, affine, *, want_f32):
    """BN (+ReLU) epilogue: returns (quantized bf16 (M,C), f32 (M,C) or None)."""
    M, C = z.shape
    f = _fold_factor(C, M)
    Mf = M // f
    zf = z.reshape(Mf, C * f)
    af = jnp.tile(affine, (1, f))
    tm = _row_tile(Mf, _APPLY_TILE_M)
    grid = (pl.cdiv(Mf, tm),)
    in_specs = [pl.BlockSpec((tm, C * f), lambda i: (i, 0)),
                pl.BlockSpec((2, C * f), lambda i: (0, 0))]
    row_spec = pl.BlockSpec((tm, C * f), lambda i: (i, 0))
    if want_f32:
        q, y = pl.pallas_call(
            _affine_qf_kernel,
            out_shape=(jax.ShapeDtypeStruct((Mf, C * f), jnp.bfloat16),
                       jax.ShapeDtypeStruct((Mf, C * f), jnp.float32)),
            grid=grid, in_specs=in_specs, out_specs=(row_spec, row_spec),
            compiler_params=_cparams(1),
        )(zf, af)
        return q.reshape(M, C), y.reshape(M, C)
    q = pl.pallas_call(
        _affine_q_kernel,
        out_shape=jax.ShapeDtypeStruct((Mf, C * f), jnp.bfloat16),
        grid=grid, in_specs=in_specs, out_specs=row_spec,
        compiler_params=_cparams(1),
    )(zf, af)
    return q.reshape(M, C), None


def _apply_merge(z, affine_z, r, affine_r, *, want_f32):
    """Fused bn2 + shortcut-BN + add + ReLU: returns (quantized bf16, f32 or None)."""
    M, C = z.shape
    f = _fold_factor(C, M)
    Mf = M // f
    zf = z.reshape(Mf, C * f)
    rf = r.reshape(Mf, C * f)
    az = jnp.tile(affine_z, (1, f))
    ar = jnp.tile(affine_r, (1, f))
    tm = _row_tile(Mf, _APPLY_TILE_M)
    grid = (pl.cdiv(Mf, tm),)
    row_spec = pl.BlockSpec((tm, C * f), lambda i: (i, 0))
    aff_spec = pl.BlockSpec((2, C * f), lambda i: (0, 0))
    in_specs = [row_spec, aff_spec, row_spec, aff_spec]
    if want_f32:
        q, y = pl.pallas_call(
            _merge_qf_kernel,
            out_shape=(jax.ShapeDtypeStruct((Mf, C * f), jnp.bfloat16),
                       jax.ShapeDtypeStruct((Mf, C * f), jnp.float32)),
            grid=grid, in_specs=in_specs, out_specs=(row_spec, row_spec),
            compiler_params=_cparams(1),
        )(zf, az, rf, ar)
        return q.reshape(M, C), y.reshape(M, C)
    q = pl.pallas_call(
        _merge_q_kernel,
        out_shape=jax.ShapeDtypeStruct((Mf, C * f), jnp.bfloat16),
        grid=grid, in_specs=in_specs, out_specs=row_spec,
        compiler_params=_cparams(1),
    )(zf, az, rf, ar)
    return q.reshape(M, C), None


def conv_bn(xq, w, gamma, beta, *, stride, padding, want_f32):
    """conv(quantized input) -> BN -> ReLU.  Returns (quantized bf16 NHWC, f32 NHWC or None)."""
    z, s0, s1, sw, (N, Ho, Wo, Cout) = _conv_raw(xq, w, stride=stride, padding=padding)
    aff = _bn_affine(s0, s1, z.shape[0], sw, gamma, beta)
    q, y = _apply_affine(z, aff, want_f32=want_f32)
    q = q.reshape(N, Ho, Wo, Cout)
    y = y.reshape(N, Ho, Wo, Cout) if y is not None else None
    return q, y


def basic_block(xq, xf, blk, *, want_f32):
    """xq: quantized bf16 block input; xf: f32 block input (only used for identity shortcut)."""
    s = blk['stride']
    h1q, _ = conv_bn(xq, blk['w1'], blk['g1'], blk['b1'],
                     stride=s, padding=1, want_f32=False)          # conv1 output only feeds conv2
    z2, s0, s1, sw, (N, Ho, Wo, Cout) = _conv_raw(h1q, blk['w2'], stride=1, padding=1)
    a2 = _bn_affine(s0, s1, z2.shape[0], sw, blk['g2'], blk['b2'])
    if 'ws' in blk:
        zs, t0, t1, tw, _ = _conv_raw(xq, blk['ws'], stride=s, padding=0)
        asc = _bn_affine(t0, t1, zs.shape[0], tw, blk['gs'], blk['bs'])
        r = zs                                                     # int16 counts
    else:
        r = xf.reshape(-1, Cout)                                   # identity shortcut (f32)
        asc = jnp.concatenate([jnp.ones((1, Cout), jnp.float32),
                               jnp.zeros((1, Cout), jnp.float32)], axis=0)
    q, y = _apply_merge(z2, a2, r, asc, want_f32=want_f32)         # bn2 + bn_sc + add + relu fused
    q = q.reshape(N, Ho, Wo, Cout)
    y = y.reshape(N, Ho, Wo, Cout) if y is not None else None
    return q, y


def resnet_expert_forward(x_nchw, params):
    x = jnp.transpose(x_nchw, (0, 2, 3, 1))              # NCHW -> NHWC (once)
    xq0 = _quantize_act(x)                               # DoReFa act quant of head input

    blocks = [b for li in range(1, 5) for b in params[f'layer{li}']]
    h = params['head']
    # f32 activation is only materialized where a downstream identity shortcut / the tail needs it
    head_want_f32 = 'ws' not in blocks[0]
    q, y = conv_bn(xq0, h['w'], h['g'], h['b'], stride=1, padding=1, want_f32=head_want_f32)
    for bi, blk in enumerate(blocks):
        nxt = blocks[bi + 1] if bi + 1 < len(blocks) else None
        want_f32 = (nxt is None) or ('ws' not in nxt)
        q, y = basic_block(q, y, blk, want_f32=want_f32)

    # tail: AdaptiveAvgPool2d(1) + Flatten + DoReFa Linear(512 -> num_classes) on f32 activation
    N, H, W, C = y.shape
    num_classes = params['fc_w'].shape[0]
    s_fc = jnp.mean(jnp.abs(params['fc_w']))
    wq_t = (jnp.sign(params['fc_w']) * s_fc).astype(jnp.float32).T      # (C, num_classes)
    out = pl.pallas_call(
        _pool_fc_kernel,
        out_shape=jax.ShapeDtypeStruct((N, num_classes), jnp.float32),
        in_specs=[VMEM_SPEC] * 3,
        out_specs=VMEM_SPEC,
        compiler_params=_cparams(0),
    )(y.reshape(N, H * W, C), wq_t, params['fc_b'].reshape(1, num_classes))
    return out


# ---------------------------- parameter setup ------------------------------

def _conv_w(key, cout, cin, k):
    fan_out = cout * k * k
    std = (2.0 / fan_out) ** 0.5
    return std * jax.random.normal(key, (cout, cin, k, k), jnp.float32)


def init_params(key, num_blocks=(2, 2, 2, 2), num_classes=10):
    keys = iter(jax.random.split(key, 64))
    params = {}
    params['head'] = dict(w=_conv_w(next(keys), 64, 3, 3),
                          g=jnp.ones((64,), jnp.float32),
                          b=jnp.zeros((64,), jnp.float32))
    in_planes = 64
    for li, (planes, stride0) in enumerate(zip((64, 128, 256, 512), (1, 2, 2, 2)), start=1):
        blks = []
        strides = [stride0] + [1] * (num_blocks[li - 1] - 1)
        for s in strides:
            blk = dict(
                w1=_conv_w(next(keys), planes, in_planes, 3),
                g1=jnp.ones((planes,), jnp.float32), b1=jnp.zeros((planes,), jnp.float32),
                w2=_conv_w(next(keys), planes, planes, 3),
                g2=jnp.ones((planes,), jnp.float32), b2=jnp.zeros((planes,), jnp.float32),
                stride=s)
            if s != 1 or in_planes != planes:
                blk['ws'] = _conv_w(next(keys), planes, in_planes, 1)
                blk['gs'] = jnp.ones((planes,), jnp.float32)
                blk['bs'] = jnp.zeros((planes,), jnp.float32)
            blks.append(blk)
            in_planes = planes
        params[f'layer{li}'] = blks
    params['fc_w'] = 0.01 * jax.random.normal(next(keys), (num_classes, 512), jnp.float32)
    params['fc_b'] = jnp.zeros((num_classes,), jnp.float32)
    return params


if __name__ == "__main__":
    key = jax.random.PRNGKey(0)
    pkey, xkey = jax.random.split(key)
    params = init_params(pkey)
    x = jax.random.normal(xkey, (2, 3, 16, 16), jnp.float32)  # NCHW, as in PyTorch
    out = resnet_expert_forward(x, params)
    jax.block_until_ready(out)
    assert out.shape == (2, 10) and out.dtype == jnp.float32
    print("KERNEL_OK")
</pallas_src>

<mosaic_0001>
module attributes {stable_mosaic.version = 11 : i64} {
  func.func @_matmul_stats_kernel(%arg0: i32, %arg1: memref<512x27xbf16, #tpu.memory_space<vmem>>, %arg2: memref<27x64xbf16, #tpu.memory_space<vmem>>, %arg3: memref<512x64xi16, #tpu.memory_space<vmem>>, %arg4: memref<1x2x64xf32, #tpu.memory_space<vmem>>) attributes {dimension_semantics = [#tpu.dimension_semantics<parallel>], iteration_bounds = array<i64: 1>, scalar_prefetch = 0 : i64, scratch_operands = 0 : i64, tpu.core_type = #tpu.core_type<tc>, window_params = [{transform_indices = @transform_0, window_bounds = array<i64: 512, 27>}, {pipeline_mode = #tpu.pipeline_mode<synchronous>, transform_indices = @transform_1, window_bounds = array<i64: 27, 64>}, {transform_indices = @transform_2, window_bounds = array<i64: 512, 64>}, {transform_indices = @transform_3, window_bounds = array<i64: 1, 2, 64>}]} {
    %c0 = arith.constant 0 : index
    %c0_0 = arith.constant 0 : index
    %0 = vector.load %arg1[%c0, %c0_0] : memref<512x27xbf16, #tpu.memory_space<vmem>>, vector<512x27xbf16>
    %c0_1 = arith.constant 0 : index
    %c0_2 = arith.constant 0 : index
    %1 = vector.load %arg2[%c0_1, %c0_2] : memref<27x64xbf16, #tpu.memory_space<vmem>>, vector<27x64xbf16>
    %cst = arith.constant dense<0.000000e+00> : vector<512x64xf32>
    %2 = tpu.matmul %0, %1, %cst {dimension_numbers = #tpu.dot_dimension_numbers<[1], [0], [0], [1], [0, 0, 1, 1], [], []>} : vector<512x27xbf16>, vector<27x64xbf16>, vector<512x64xf32> -> vector<512x64xf32>
    %c512_i32 = arith.constant 512 : i32
    %3 = arith.muli %arg0, %c512_i32 : i32
    %4 = tpu.iota {dimensions = array<i32: 0>} : vector<512x64xi32>
    %5 = vector.broadcast %3 : i32 to vector<512x64xi32>
    %6 = arith.addi %5, %4 : vector<512x64xi32>
    %c512_i32_3 = arith.constant 512 : i32
    %7 = vector.broadcast %c512_i32_3 : i32 to vector<512x64xi32>
    %8 = arith.cmpi slt, %6, %7 : vector<512x64xi32>
    %cst_4 = arith.constant 0.000000e+00 : f32
    %9 = vector.broadcast %cst_4 : f32 to vector<512x64xf32>
    %10 = arith.select %8, %2, %9 : vector<512x64xi1>, vector<512x64xf32>
    %11 = arith.fptosi %10 : vector<512x64xf32> to vector<512x64xi16>
    %c0_5 = arith.constant 0 : index
    %c0_6 = arith.constant 0 : index
    %12 = vector.load %arg3[%c0_5, %c0_6] : memref<512x64xi16, #tpu.memory_space<vmem>>, vector<512x64xi16>
    tpu.vector_store %arg3[%c0_5, %c0_6], %11 {strides = array<i32>} : memref<512x64xi16, #tpu.memory_space<vmem>>, vector<512x64xi16>,
    %cst_7 = arith.constant dense<0.000000e+00> : vector<64xf32>
    %13 = vector.multi_reduction <add>, %10, %cst_7 [0] : vector<512x64xf32> to vector<64xf32>
    %14 = vector.shape_cast %13 : vector<64xf32> to vector<1x64xf32>
    %c0_8 = arith.constant 0 : index
    %c0_9 = arith.constant 0 : index
    %c0_10 = arith.constant 0 : index
    %15 = vector.load %arg4[%c0_8, %c0_9, %c0_10] : memref<1x2x64xf32, #tpu.memory_space<vmem>>, vector<1x1x64xf32>
    %16 = vector.shape_cast %15 : vector<1x1x64xf32> to vector<1x64xf32>
    %17 = vector.shape_cast %14 : vector<1x64xf32> to vector<1x1x64xf32>
    tpu.vector_store %arg4[%c0_8, %c0_9, %c0_10], %17 {strides = array<i32>} : memref<1x2x64xf32, #tpu.memory_space<vmem>>, vector<1x1x64xf32>,
    %18 = arith.mulf %10, %10 : vector<512x64xf32>
    %cst_11 = arith.constant dense<0.000000e+00> : vector<64xf32>
    %19 = vector.multi_reduction <add>, %18, %cst_11 [0] : vector<512x64xf32> to vector<64xf32>
    %20 = vector.shape_cast %19 : vector<64xf32> to vector<1x64xf32>
    %c0_12 = arith.constant 0 : index
    %c1 = arith.constant 1 : index
    %c0_13 = arith.constant 0 : index
    %21 = vector.load %arg4[%c0_12, %c1, %c0_13] : memref<1x2x64xf32, #tpu.memory_space<vmem>>, vector<1x1x64xf32>
    %22 = vector.shape_cast %21 : vector<1x1x64xf32> to vector<1x64xf32>
    %23 = vector.shape_cast %20 : vector<1x64xf32> to vector<1x1x64xf32>
    tpu.vector_store %arg4[%c0_12, %c1, %c0_13], %23 {strides = array<i32>} : memref<1x2x64xf32, #tpu.memory_space<vmem>>, vector<1x1x64xf32>,
    return
  }
  func.func @transform_0(%arg0: i32) -> (i32, i32) {
    %c0_i32 = arith.constant 0 : i32
    %c0_i32_0 = arith.constant 0 : i32
    return %arg0, %c0_i32 : i32, i32
  }
  func.func @transform_1(%arg0: i32) -> (i32, i32) {
    %c0_i32 = arith.constant 0 : i32
    %c0_i32_0 = arith.constant 0 : i32
    %c0_i32_1 = arith.constant 0 : i32
    return %c0_i32, %c0_i32_0 : i32, i32
  }
  func.func @transform_2(%arg0: i32) -> (i32, i32) {
    %c0_i32 = arith.constant 0 : i32
    %c0_i32_0 = arith.constant 0 : i32
    return %arg0, %c0_i32 : i32, i32
  }
  func.func @transform_3(%arg0: i32) -> (i32, i32, i32) {
    %c0_i32 = arith.constant 0 : i32
    %c0_i32_0 = arith.constant 0 : i32
    %c0_i32_1 = arith.constant 0 : i32
    return %arg0, %c0_i32, %c0_i32_0 : i32, i32, i32
  }
}

</mosaic_0001>

<bundles_post_ra>
// kernel: tpu_custom_call.1
= control target key start
LH: loop header
LB: loop body
LE: loop exit
PB: predicated region body
PF: predicated region fallthrough
CT: control target
= control target key end

     0   :  { %vm351_vm0 = vcmask 1044480   ;;  %vm352_vm1 = vcmask 1045504   ;;  %v1937_v1 = vmov 65535   ;;  %vm254_vm2 = vcmask 220160   ;;  %s2714_s0 = inlined_call_operand.vmem [shape: bf16[512,27], index: 0, kind: input, shape index: {}]   ;;  %s2715_s1 = inlined_call_operand.vmem [shape: bf16[27,64], index: 1, kind: input, shape index: {}]   ;;  %s2716_s2 = inlined_call_operand.vmem [shape: s16[512,64], index: 2, kind: output, shape index: {0}]   ;;  %s2717_s3 = inlined_call_operand.hbm [shape: f32[1,2,64], index: 3, kind: output, shape index: {1}]  }
   0x1   :  { %v1881_v0 = vld [vmem:[%s2715_s1 + $0x8] sm:$0x3f]   ;;  %v353_v2 = vsel %vm351_vm0, 4294967295, %v1937_v1  ;;  %v1883_v3 = vld [vmem:[%s2714_s0] sm:$0xff]   ;;  %v1885_v8 = vld [vmem:[%s2714_s0 + $0x10] sm:$0xff]  }
   0x2   :  { %v354_v4 = vsel %vm352_vm1, %v353_v2, 0  ;;  %v1882_v6 = vld [vmem:[%s2715_s1] sm:$0xff]   ;;  %1683 = vmatprep.mubr.msk.bf16.mxu0 %vm254_vm2, %v1883_v3  ;;  %v1884_v7 = vld [vmem:[%s2714_s0 + $0x8] sm:$0xff]   ;;  %v1886_v9 = vld [vmem:[%s2714_s0 + $0x18] sm:$0xff]  }
   0x3   :  { %v356_v5 = vand.u32 %v1881_v0, %v354_v4  ;;  %v1887_v10 = vld [vmem:[%s2714_s0 + $0x20] sm:$0xff]   ;;  %v1900_v12 = vld [vmem:[%s2714_s0 + $0x88] sm:$0xff]   ;;  %v1901_v13 = vld [vmem:[%s2714_s0 + $0x90] sm:$0xff]  }
   0x4   :  { %v1899_v11 = vld [vmem:[%s2714_s0 + $0x80] sm:$0xff]   ;;  %v1888_v14 = vld [vmem:[%s2714_s0 + $0x28] sm:$0xff]   ;;  %v1889_v15 = vld [vmem:[%s2714_s0 + $0x30] sm:$0xff]  }
   0x5   :  { %1679 = vmatprep.subr.bf16.mxu0 %v356_v5  ;;  %1747 = vmatprep.subr.bf16.mxu1 %v356_v5  ;;  %v1902_v16 = vld [vmem:[%s2714_s0 + $0x98] sm:$0xff]   ;;  %v1903_v17 = vld [vmem:[%s2714_s0 + $0xa0] sm:$0xff]   ;;  %v1904_v19 = vld [vmem:[%s2714_s0 + $0xa8] sm:$0xff]  }
   0x6   :  { %1680 = vmatpush3.bf16.msra.mxu0 %v356_v5  ;;  %1749 = vmatpush3.bf16.msra.mxu1 %v356_v5  ;;  %v1890_v18 = vld [vmem:[%s2714_s0 + $0x38] sm:$0xff]  }
   0x7   :  { %1681 = vmatprep.subr.bf16.mxu0 %v1882_v6  ;;  %1748 = vmatprep.subr.bf16.mxu1 %v1882_v6 }
   0x8   :  { %1715 = vmatprep.mubr.msk.bf16.mxu1 %vm254_vm2, %v1899_v11 }
   0xa   :  { %1682 = vmatpush3.bf16.msra.mxu0 %v1882_v6  ;;  %1750 = vmatpush3.bf16.msra.mxu1 %v1882_v6 }
   0xd   :  { %1684 = vmatmul.mubr.msk.bf16.vlgmr.msra.gmra.mxu0 %vm254_vm2, %v1884_v7  ;;  %1716 = vmatmul.mubr.msk.bf16.vlgmr.msra.gmra.mxu1 %vm254_vm2, %v1900_v12 }
   0xe   :  { %1687 = vmatprep.mubr.msk.bf16.mxu0 %vm254_vm2, %v1885_v8  ;;  %1719 = vmatprep.mubr.msk.bf16.mxu1 %vm254_vm2, %v1901_v13 }
  0x15   :  { %1688 = vmatmul.mubr.msk.bf16.gmra.mxu0 %vm254_vm2, %v1886_v9  ;;  %1720 = vmatmul.mubr.msk.bf16.gmra.mxu1 %vm254_vm2, %v1902_v16 }
  0x16   :  { %1691 = vmatprep.mubr.msk.bf16.mxu0 %vm254_vm2, %v1887_v10  ;;  %1723 = vmatprep.mubr.msk.bf16.mxu1 %vm254_vm2, %v1903_v17 }
  0x1d   :  { %1692 = vmatmul.mubr.msk.bf16.gmra.mxu0 %vm254_vm2, %v1888_v14 }
  0x1e   :  { %1695 = vmatprep.mubr.msk.bf16.mxu0 %vm254_vm2, %v1889_v15 }
  0x1f   :  { %9 = vsyncpa [#allocation3], 0  ;;  %v1891_v20 = vld [vmem:[%s2714_s0 + $0x40] sm:$0xff]   ;;  %v1905_v21 = vld [vmem:[%s2714_s0 + $0xb0] sm:$0xff]   ;;  %1724 = vmatmul.mubr.msk.bf16.gmra.mxu1 %vm254_vm2, %v1904_v19  ;;  %vm1227_vm3 = vcmask 523264   ;;  %vm1162_vm4 = vcmask 519168  }
  0x20   :  { %1727 = vmatprep.mubr.msk.bf16.mxu1 %vm254_vm2, %v1905_v21  ;;  %v1892_v22 = vld [vmem:[%s2714_s0 + $0x48] sm:$0xff]   ;;  %v1906_v23 = vld [vmem:[%s2714_s0 + $0xb8] sm:$0xff]   ;;  %v1893_v24 = vld [vmem:[%s2714_s0 + $0x50] sm:$0xff]   ;;  %vm1361_vm5 = vcmask 516096   ;;  %s1938_s7 = smov [#allocation2]  }
  0x21   :  { %v1907_v25 = vld [vmem:[%s2714_s0 + $0xc0] sm:$0xff]   ;;  %v1894_v26 = vld [vmem:[%s2714_s0 + $0x58] sm:$0xff]   ;;  %v1908_v27 = vld [vmem:[%s2714_s0 + $0xc8] sm:$0xff]   ;;  %s1569_s8 = sshll.u32 %s1938_s7, 4  ;;  %s1570_s8 = int_to_ptr.vmem [resolvable:$true] %s1569_s8 }
  0x22   :  { %v1895_v28 = vld [vmem:[%s2714_s0 + $0x60] sm:$0xff]   ;;  %v1909_v29 = vld [vmem:[%s2714_s0 + $0xd0] sm:$0xff]   ;;  %v1896_v30 = vld [vmem:[%s2714_s0 + $0x68] sm:$0xff]   ;;  %s1915_s9 = scalar_lea.vmem %s1570_s8, 32  ;;  %p1920_p1 = scmp.lt.s32.totalorder %s1570_s8, %s1570_s8 }
  0x23   :  { %v1910_v31 = vld [vmem:[%s2714_s0 + $0xd8] sm:$0xff]   ;;  %v1897_v32 = vld [vmem:[%s2714_s0 + $0x70] sm:$0xff]   ;;  %v1911_v33 = vld [vmem:[%s2714_s0 + $0xe0] sm:$0xff]   ;;  %p1916_p0 = scmp.ne.s32.totalorder %s1570_s8, %s1915_s9  ;;  %p1921_p2 = scmp.lt.s32.totalorder %s1915_s9, %s1915_s9 }
  0x24   :  { %v1898_v34 = vld [vmem:[%s2714_s0 + $0x78] sm:$0xff]   ;;  %v1912_v35 = vld [vmem:[%s2714_s0 + $0xe8] sm:$0xff]   ;;  %v1913_v36 = vld [vmem:[%s2714_s0 + $0xf0] sm:$0xff]  }
  0x25   :  { %1696 = vmatmul.mubr.msk.bf16.gmra.mxu0 %vm254_vm2, %v1890_v18  ;;  %v1914_v37 = vld [vmem:[%s2714_s0 + $0xf8] sm:$0xff]   ;;  %p1922_p3 = por %p1921_p2, %p1920_p1 }
  0x26   :  { %1699 = vmatprep.mubr.msk.bf16.mxu0 %vm254_vm2, %v1891_v20 }
  0x27   :  { %1728 = vmatmul.mubr.msk.bf16.gmra.mxu1 %vm254_vm2, %v1906_v23  ;;  %p1923_p4 = pnand %p1922_p3, %p1916_p0 }
  0x28   :  { %1731 = vmatprep.mubr.msk.bf16.mxu1 %vm254_vm2, %v1907_v25 }
  0x2d   :  { %1700 = vmatmul.mubr.msk.bf16.gmra.mxu0 %vm254_vm2, %v1892_v22 }
  0x2e   :  { %1703 = vmatprep.mubr.msk.bf16.mxu0 %vm254_vm2, %v1893_v24 }
  0x2f   :  { %1732 = vmatmul.mubr.msk.bf16.gmra.mxu1 %vm254_vm2, %v1908_v27 }
  0x30   :  { %1735 = vmatprep.mubr.msk.bf16.mxu1 %vm254_vm2, %v1909_v29 }
  0x35   :  { %1704 = vmatmul.mubr.msk.bf16.gmra.mxu0 %vm254_vm2, %v1894_v26 }
  0x36   :  { %1707 = vmatprep.mubr.msk.bf16.mxu0 %vm254_vm2, %v1895_v28 }
  0x37   :  { %1736 = vmatmul.mubr.msk.bf16.gmra.mxu1 %vm254_vm2, %v1910_v31 }
  0x38   :  { %1739 = vmatprep.mubr.msk.bf16.mxu1 %vm254_vm2, %v1911_v33 }
  0x3d   :  { %1708 = vmatmul.mubr.msk.bf16.gmra.mxu0 %vm254_vm2, %v1896_v30 }
  0x3e   :  { %1711 = vmatprep.mubr.msk.bf16.mxu0 %vm254_vm2, %v1897_v32 }
  0x3f   :  { %1740 = vmatmul.mubr.msk.bf16.gmra.mxu1 %vm254_vm2, %v1912_v35 }
  0x40   :  { %1743 = vmatprep.mubr.msk.bf16.mxu1 %vm254_vm2, %v1913_v36 }
  0x45   :  { %1712 = vmatmul.mubr.msk.bf16.gmra.mxu0 %vm254_vm2, %v1898_v34 }
  0x47   :  { %1744 = vmatmul.mubr.msk.bf16.gmra.mxu1 %vm254_vm2, %v1914_v37 }
  0xcd   :  { %v1685_v38 = vpop.f32.mrf.mxu0 }
  0xce   :  { %v908_v39 = vmax.f32 %v1685_v38, -32768.0  ;;  %v1365_v40 = vmul.f32 %v1685_v38, %v1685_v38  ;;  %v1231_v48 = vsel %vm1227_vm3, %v1685_v38, 0.0 }
  0xcf   :  { %v392_v41 = vpop.f32.mrf.mxu0 }
  0xd0   :  { %v972_v42 = vmin.f32 %v908_v39, 32767.0  ;;  %v906_v43 = vmax.f32 %v392_v41, -32768.0  ;;  %v1430_v49 = vsel %vm1227_vm3, %v1365_v40, 0.0  ;;  %v1363_v50 = vmul.f32 %v392_v41, %v392_v41 }
  0xd1   :  { %v1686_v44 = vpop.f32.mrf.mxu0  ;;  %v1228_v56 = vsel %vm1227_vm3, %v392_v41, 0.0 }
  0xd2   :  { %v1755_v45 = vtrunc.f32 %v972_v42  ;;  %v970_v46 = vmin.f32 %v906_v43, 32767.0  ;;  %v909_v47 = vmax.f32 %v1686_v44, -32768.0  ;;  %v1366_v57 = vmul.f32 %v1686_v44, %v1686_v44 }
  0xd3   :  { %v395_v51 = vpop.f32.mrf.mxu0  ;;  %v1427_v1 = vsel %vm1227_vm3, %v1363_v50, 0.0  ;;  %v1233_v10 = vsel %vm1227_vm3, %v1686_v44, 0.0 }
  0xd4   :  { %v1756_v52 = vcvt.f32.s32 %v1755_v45  ;;  %v1751_v53 = vtrunc.f32 %v970_v46  ;;  %v973_v54 = vmin.f32 %v909_v47, 32767.0  ;;  %v907_v55 = vmax.f32 %v395_v51, -32768.0 }
  0xd5   :  { %v1229_v58 = vsel %vm1227_vm3, %v395_v51, 0.0  ;;  %v1364_v59 = vmul.f32 %v395_v51, %v395_v51  ;;  %v1689_v60 = vpop.f32.mrf.mxu0  ;;  %v1432_v16 = vsel %vm1227_vm3, %v1366_v57, 0.0 }
  0xd6   :  { %v1100_v61 = vpack.c.b16 %v1756_v52, %v1756_v52  ;;  %v1752_v62 = vcvt.f32.s32 %v1751_v53  ;;  %v1757_v63 = vtrunc.f32 %v973_v54  ;;  %v971_v0 = vmin.f32 %v907_v55, 32767.0 }
  0xd7   :  { %v1230_v2 = vadd.f32 %v1229_v58, %v1228_v56  ;;  %v1428_v3 = vsel %vm1227_vm3, %v1364_v59, 0.0  ;;  %v912_v4 = vmax.f32 %v1689_v60, -32768.0  ;;  %v408_v5 = vpop.f32.mrf.mxu0  ;;  %v1369_v29 = vmul.f32 %v1689_v60, %v1689_v60 }
  0xd8   :  { %1165 = vst.msk [vmem:[%s2716_s2 + $0x8] sm:$0xf] %vm1162_vm4, %v1100_v61  ;;  %v1098_v6 = vpack.c.b16 %v1752_v62, %v1752_v62  ;;  %v1758_v7 = vcvt.f32.s32 %v1757_v63  ;;  %v1753_v8 = vtrunc.f32 %v971_v0  ;;  %v1429_v9 = vadd.f32 %v1428_v3, %v1427_v1 }
  0xd9   :  { %v1232_v11 = vadd.f32 %v1231_v48, %v1230_v2  ;;  %v976_v12 = vmin.f32 %v912_v4, 32767.0  ;;  %v910_v13 = vmax.f32 %v408_v5, -32768.0  ;;  %v1690_v14 = vpop.f32.mrf.mxu0  ;;  %v1235_v22 = vsel %vm1227_vm3, %v408_v5, 0.0 }
  0xda   :  { %1163 = vst.msk [vmem:[%s2716_s2] sm:$0xf] %vm1162_vm4, %v1098_v6  ;;  %v1101_v15 = vpack.c.b16 %v1758_v7, %v1758_v7  ;;  %v1754_v17 = vcvt.f32.s32 %v1753_v8  ;;  %v1431_v18 = vadd.f32 %v1430_v49, %v1429_v9  ;;  %v1367_v25 = vmul.f32 %v408_v5, %v408_v5 }
  0xdb   :  { %v1763_v19 = vtrunc.f32 %v976_v12  ;;  %v974_v20 = vmin.f32 %v910_v13, 32767.0  ;;  %v1234_v21 = vadd.f32 %v1233_v10, %v1232_v11  ;;  %v411_v23 = vpop.f32.mrf.mxu0  ;;  %v913_v27 = vmax.f32 %v1690_v14, -32768.0 }
  0xdc   :  { %1166 = vst.msk [vmem:[%s2716_s2 + $0xc] sm:$0xf] %vm1162_vm4, %v1101_v15  ;;  %v1099_v24 = vpack.c.b16 %v1754_v17, %v1754_v17  ;;  %v1433_v26 = vadd.f32 %v1432_v16, %v1431_v18  ;;  %v1239_v33 = vsel %vm1227_vm3, %v1689_v60, 0.0  ;;  %v1434_v34 = vsel %vm1227_vm3, %v1367_v25, 0.0 }
  0xdd   :  { %v1764_v28 = vcvt.f32.s32 %v1763_v19  ;;  %v1759_v30 = vtrunc.f32 %v974_v20  ;;  %v1236_v31 = vadd.f32 %v1235_v22, %v1234_v21  ;;  %v1693_v32 = vpop.f32.mrf.mxu0  ;;  %v977_v35 = vmin.f32 %v913_v27, 32767.0 }
  0xde   :  { %1164 = vst.msk [vmem:[%s2716_s2 + $0x4] sm:$0xf] %vm1162_vm4, %v1099_v24  ;;  %v911_v36 = vmax.f32 %v411_v23, -32768.0  ;;  %v1370_v39 = vmul.f32 %v1690_v14, %v1690_v14  ;;  %v1237_v40 = vsel %vm1227_vm3, %v411_v23, 0.0  ;;  %v1435_v42 = vadd.f32 %v1434_v34, %v1433_v26 }
  0xdf   :  { %v1104_v37 = vpack.c.b16 %v1764_v28, %v1764_v28  ;;  %v1760_v38 = vcvt.f32.s32 %v1759_v30  ;;  %v424_v41 = vpop.f32.mrf.mxu0  ;;  %v1765_v43 = vtrunc.f32 %v977_v35  ;;  %v1238_v45 = vadd.f32 %v1237_v40, %v1236_v31 }
  0xe0   :  { %v975_v44 = vmin.f32 %v911_v36, 32767.0  ;;  %v1438_v46 = vsel %vm1227_vm3, %v1369_v29, 0.0  ;;  %v1368_v48 = vmul.f32 %v411_v23, %v411_v23  ;;  %v916_v49 = vmax.f32 %v1693_v32, -32768.0 }
  0xe1   :  { %1169 = vst.msk [vmem:[%s2716_s2 + $0x18] sm:$0xf] %vm1162_vm4, %v1104_v37  ;;  %v1102_v47 = vpack.c.b16 %v1760_v38, %v1760_v38  ;;  %v1694_v50 = vpop.f32.mrf.mxu0  ;;  %v1766_v51 = vcvt.f32.s32 %v1765_v43  ;;  %v1241_v52 = vsel %vm1227_vm3, %v1690_v14, 0.0  ;;  %v1240_v54 = vadd.f32 %v1239_v33, %v1238_v45 }
  0xe2   :  { %v1761_v53 = vtrunc.f32 %v975_v44  ;;  %v1440_v55 = vsel %vm1227_vm3, %v1370_v39, 0.0  ;;  %v1436_v56 = vsel %vm1227_vm3, %v1368_v48, 0.0  ;;  %v980_v57 = vmin.f32 %v916_v49, 32767.0 }
  0xe3   :  { %1167 = vst.msk [vmem:[%s2716_s2 + $0x10] sm:$0xf] %vm1162_vm4, %v1102_v47  ;;  %v914_v58 = vmax.f32 %v424_v41, -32768.0  ;;  %v427_v59 = vpop.f32.mrf.mxu0  ;;  %v1105_v60 = vpack.c.b16 %v1766_v51, %v1766_v51  ;;  %v1437_v62 = vadd.f32 %v1436_v56, %v1435_v42  ;;  %v1247_v63 = vsel %vm1227_vm3, %v1693_v32, 0.0 }
  0xe4   :  { %v1762_v61 = vcvt.f32.s32 %v1761_v53  ;;  %v1771_v0 = vtrunc.f32 %v980_v57  ;;  %v1242_v2 = vadd.f32 %v1241_v52, %v1240_v54  ;;  %v1371_v3 = vmul.f32 %v424_v41, %v424_v41 }
  0xe5   :  { %v978_v1 = vmin.f32 %v914_v58, 32767.0  ;;  %v2134_v4 = vpop.f32.mrf.mxu0  ;;  %1170 = vst.msk [vmem:[%s2716_s2 + $0x1c] sm:$0xf] %vm1162_vm4, %v1105_v60  ;;  %v1439_v6 = vadd.f32 %v1438_v46, %v1437_v62  ;;  %v1243_v7 = vsel %vm1227_vm3, %v424_v41, 0.0  ;;  %v917_v8 = vmax.f32 %v1694_v50, -32768.0 }
  0xe6   :  { %v1103_v5 = vpack.c.b16 %v1762_v61, %v1762_v61  ;;  %v1772_v9 = vcvt.f32.s32 %v1771_v0  ;;  %v1373_v10 = vmul.f32 %v1693_v32, %v1693_v32  ;;  %v1244_v12 = vadd.f32 %v1243_v7, %v1242_v2  ;;  %v2155_v32 = vpop.f32.mrf.mxu1 }
  0xe7   :  { %v1767_v11 = vtrunc.f32 %v978_v1  ;;  %v440_v13 = vpop.f32.mrf.mxu0  ;;  %v1441_v14 = vadd.f32 %v1440_v55, %v1439_v6  ;;  %v1442_v15 = vsel %vm1227_vm3, %v1371_v3, 0.0  ;;  %v981_v16 = vmin.f32 %v917_v8, 32767.0 }
  0xe8   :  { %1168 = vst.msk [vmem:[%s2716_s2 + $0x14] sm:$0xf] %vm1162_vm4, %v1103_v5  ;;  %v915_v17 = vmax.f32 %v427_v59, -32768.0  ;;  %v1108_v18 = vpack.c.b16 %v1772_v9, %v1772_v9  ;;  %v1245_v20 = vsel %vm1227_vm3, %v427_v59, 0.0  ;;  %v1372_v21 = vmul.f32 %v427_v59, %v427_v59  ;;  %v2167_v52 = vpop.f32.mrf.mxu1 }
  0xe9   :  { %v1768_v19 = vcvt.f32.s32 %v1767_v11  ;;  %v2147_v22 = vpop.f32.mrf.mxu0  ;;  %v1443_v23 = vadd.f32 %v1442_v15, %v1441_v14  ;;  %v1773_v24 = vtrunc.f32 %v981_v16  ;;  %v1374_v25 = vmul.f32 %v1694_v50, %v1694_v50 }
  0xea   :  { %v979_v26 = vmin.f32 %v915_v17, 32767.0  ;;  %1173 = vst.msk [vmem:[%s2716_s2 + $0x28] sm:$0xf] %vm1162_vm4, %v1108_v18  ;;  %v1246_v28 = vadd.f32 %v1245_v20, %v1244_v12  ;;  %v1444_v29 = vsel %vm1227_vm3, %v1372_v21, 0.0  ;;  %v920_v30 = vmax.f32 %v2134_v4, -32768.0  ;;  %v2188_v7 = vpop.f32.mrf.mxu1 }
  0xeb   :  { %v1106_v27 = vpack.c.b16 %v1768_v19, %v1768_v19  ;;  %v443_v31 = vpop.f32.mrf.mxu0  ;;  %v1446_v33 = vsel %vm1227_vm3, %v1373_v10, 0.0  ;;  %v1774_v34 = vcvt.f32.s32 %v1773_v24  ;;  %v1445_v36 = vadd.f32 %v1444_v29, %v1443_v23 }
  0xec   :  { %v1769_v35 = vtrunc.f32 %v979_v26  ;;  %v1249_v37 = vsel %vm1227_vm3, %v1694_v50, 0.0  ;;  %v1248_v38 = vadd.f32 %v1247_v63, %v1246_v28  ;;  %v984_v39 = vmin.f32 %v920_v30, 32767.0  ;;  %v2208_v26 = vpop.f32.mrf.mxu1 }
  0xed   :  { %1171 = vst.msk [vmem:[%s2716_s2 + $0x20] sm:$0xf] %vm1162_vm4, %v1106_v27  ;;  %v918_v40 = vmax.f32 %v440_v13, -32768.0  ;;  %v2163_v41 = vpop.f32.mrf.mxu0  ;;  %v1109_v42 = vpack.c.b16 %v1774_v34, %v1774_v34  ;;  %v1448_v43 = vsel %vm1227_vm3, %v1374_v25, 0.0  ;;  %v1447_v45 = vadd.f32 %v1446_v33, %v1445_v36 }
  0xee   :  { %v1770_v44 = vcvt.f32.s32 %v1769_v35  ;;  %v1779_v46 = vtrunc.f32 %v984_v39  ;;  %v1250_v48 = vadd.f32 %v1249_v37, %v1248_v38  ;;  %v1251_v49 = vsel %vm1227_vm3, %v440_v13, 0.0 }
  0xef   :  { %v982_v47 = vmin.f32 %v918_v40, 32767.0  ;;  %v456_v51 = vpop.f32.mrf.mxu0  ;;  %1174 = vst.msk [vmem:[%s2716_s2 + $0x2c] sm:$0xf] %vm1162_vm4, %v1109_v42  ;;  %v1375_v53 = vmul.f32 %v440_v13, %v440_v13  ;;  %v1449_v54 = vadd.f32 %v1448_v43, %v1447_v45  ;;  %v921_v55 = vmax.f32 %v2147_v22, -32768.0 }
  0xf0   :  { %v1107_v50 = vpack.c.b16 %v1770_v44, %v1770_v44  ;;  %v1780_v56 = vcvt.f32.s32 %v1779_v46  ;;  %v1377_v57 = vmul.f32 %v2134_v4, %v2134_v4  ;;  %v1252_v59 = vadd.f32 %v1251_v49, %v1250_v48  ;;  %v2224_v46 = vpop.f32.mrf.mxu1 }
  0xf1   :  { %v1775_v58 = vtrunc.f32 %v982_v47  ;;  %v2176_v60 = vpop.f32.mrf.mxu0  ;;  %v1255_v61 = vsel %vm1227_vm3, %v2134_v4, 0.0  ;;  %v1450_v62 = vsel %vm1227_vm3, %v1375_v53, 0.0  ;;  %v985_v63 = vmin.f32 %v921_v55, 32767.0 }
  0xf2   :  { %1172 = vst.msk [vmem:[%s2716_s2 + $0x24] sm:$0xf] %vm1162_vm4, %v1107_v50  ;;  %v919_v0 = vmax.f32 %v443_v31, -32768.0  ;;  %v1112_v1 = vpack.c.b16 %v1780_v56, %v1780_v56  ;;  %v1378_v3 = vmul.f32 %v2147_v22, %v2147_v22  ;;  %v1253_v5 = vsel %vm1227_vm3, %v443_v31, 0.0 }
  0xf3   :  { %v1776_v2 = vcvt.f32.s32 %v1775_v58  ;;  %v459_v6 = vpop.f32.mrf.mxu0  ;;  %v1451_v8 = vadd.f32 %v1450_v62, %v1449_v54  ;;  %v1781_v9 = vtrunc.f32 %v985_v63  ;;  %v1254_v11 = vadd.f32 %v1253_v5, %v1252_v59 }
  0xf4   :  { %v983_v10 = vmin.f32 %v919_v0, 32767.0  ;;  %1177 = vst.msk [vmem:[%s2716_s2 + $0x38] sm:$0xf] %vm1162_vm4, %v1112_v1  ;;  %v1454_v4 = vsel %vm1227_vm3, %v1377_v57, 0.0  ;;  %v1376_v13 = vmul.f32 %v443_v31, %v443_v31  ;;  %v924_v14 = vmax.f32 %v2163_v41, -32768.0  ;;  %v2242_v1 = vpop.f32.mrf.mxu1 }
  0xf5   :  { %v1110_v12 = vpack.c.b16 %v1776_v2, %v1776_v2  ;;  %v2196_v15 = vpop.f32.mrf.mxu0  ;;  %v1782_v16 = vcvt.f32.s32 %v1781_v9  ;;  %v1257_v17 = vsel %vm1227_vm3, %v2147_v22, 0.0  ;;  %v1256_v19 = vadd.f32 %v1255_v61, %v1254_v11 }
  0xf6   :  { %v1777_v18 = vtrunc.f32 %v983_v10  ;;  %v1456_v20 = vsel %vm1227_vm3, %v1378_v3, 0.0  ;;  %v1452_v21 = vsel %vm1227_vm3, %v1376_v13, 0.0  ;;  %v988_v23 = vmin.f32 %v924_v14, 32767.0 }
  0xf7   :  { %1175 = vst.msk [vmem:[%s2716_s2 + $0x30] sm:$0xf] %vm1162_vm4, %v1110_v12  ;;  %v922_v24 = vmax.f32 %v456_v51, -32768.0  ;;  %v2206_v25 = vpop.f32.mrf.mxu0  ;;  %v1113_v27 = vpack.c.b16 %v1782_v16, %v1782_v16  ;;  %v1453_v22 = vadd.f32 %v1452_v21, %v1451_v8  ;;  %v1263_v29 = vsel %vm1227_vm3, %v2163_v41, 0.0  ;;  %v2255_v21 = vpop.f32.mrf.mxu1 }
  0xf8   :  { %v1778_v28 = vcvt.f32.s32 %v1777_v18  ;;  %v1787_v30 = vtrunc.f32 %v988_v23  ;;  %v1258_v33 = vadd.f32 %v1257_v17, %v1256_v19  ;;  %v1379_v34 = vmul.f32 %v456_v51, %v456_v51 }
  0xf9   :  { %v986_v31 = vmin.f32 %v922_v24, 32767.0  ;;  %v2212_v35 = vpop.f32.mrf.mxu0  ;;  %1178 = vst.msk [vmem:[%s2716_s2 + $0x3c] sm:$0xf] %vm1162_vm4, %v1113_v27  ;;  %v1455_v37 = vadd.f32 %v1454_v4, %v1453_v22  ;;  %v1259_v38 = vsel %vm1227_vm3, %v456_v51, 0.0  ;;  %v925_v39 = vmax.f32 %v2176_v60, -32768.0 }
  0xfa   :  { %v1111_v36 = vpack.c.b16 %v1778_v28, %v1778_v28  ;;  %v1788_v40 = vcvt.f32.s32 %v1787_v30  ;;  %v1381_v42 = vmul.f32 %v2163_v41, %v2163_v41  ;;  %v1260_v44 = vadd.f32 %v1259_v38, %v1258_v33 }
  0xfb   :  { %v1783_v43 = vtrunc.f32 %v986_v31  ;;  %v2222_v45 = vpop.f32.mrf.mxu0  ;;  %v1457_v47 = vadd.f32 %v1456_v20, %v1455_v37  ;;  %v1458_v48 = vsel %vm1227_vm3, %v1379_v34, 0.0  ;;  %v989_v49 = vmin.f32 %v925_v39, 32767.0 }
  0xfc   :  { %1176 = vst.msk [vmem:[%s2716_s2 + $0x34] sm:$0xf] %vm1162_vm4, %v1111_v36  ;;  %v923_v51 = vmax.f32 %v459_v6, -32768.0  ;;  %v1116_v50 = vpack.c.b16 %v1788_v40, %v1788_v40  ;;  %v1261_v41 = vsel %vm1227_vm3, %v459_v6, 0.0  ;;  %v1380_v54 = vmul.f32 %v459_v6, %v459_v6 }
  0xfd   :  { %v1784_v53 = vcvt.f32.s32 %v1783_v43  ;;  %v1459_v55 = vadd.f32 %v1458_v48, %v1457_v47  ;;  %v1789_v56 = vtrunc.f32 %v989_v49  ;;  %v1382_v57 = vmul.f32 %v2176_v60, %v2176_v60  ;;  %v2234_v59 = vpop.f32.mrf.mxu0 }
  0xfe   :  { %v987_v58 = vmin.f32 %v923_v51, 32767.0  ;;  %1181 = vst.msk [vmem:[%s2716_s2 + $0x48] sm:$0xf] %vm1162_vm4, %v1116_v50  ;;  %v1262_v62 = vadd.f32 %v1261_v41, %v1260_v44  ;;  %v1460_v63 = vsel %vm1227_vm3, %v1380_v54, 0.0  ;;  %v928_v0 = vmax.f32 %v2196_v15, -32768.0 }
  0xff   :  { %v1114_v61 = vpack.c.b16 %v1784_v53, %v1784_v53  ;;  %v1462_v2 = vsel %vm1227_vm3, %v1381_v42, 0.0  ;;  %v1790_v3 = vcvt.f32.s32 %v1789_v56  ;;  %v1461_v6 = vadd.f32 %v1460_v63, %v1459_v55  ;;  %v488_v16 = vpop.f32.mrf.mxu0  ;;  %v2280_v42 = vpop.f32.mrf.mxu1 }
 0x100   :  { %v1785_v5 = vtrunc.f32 %v987_v58  ;;  %v1265_v8 = vsel %vm1227_vm3, %v2176_v60, 0.0  ;;  %v1264_v9 = vadd.f32 %v1263_v29, %v1262_v62  ;;  %v992_v10 = vmin.f32 %v928_v0, 32767.0 }
 0x101   :  { %1179 = vst.msk [vmem:[%s2716_s2 + $0x40] sm:$0xf] %vm1162_vm4, %v1114_v61  ;;  %v926_v11 = vmax.f32 %v2206_v25, -32768.0  ;;  %v1117_v4 = vpack.c.b16 %v1790_v3, %v1790_v3  ;;  %v1464_v12 = vsel %vm1227_vm3, %v1382_v57, 0.0  ;;  %v1463_v14 = vadd.f32 %v1462_v2, %v1461_v6  ;;  %v2274_v36 = vpop.f32.mrf.mxu0  ;;  %v2298_v62 = vpop.f32.mrf.mxu1 }
 0x102   :  { %v1786_v13 = vcvt.f32.s32 %v1785_v5  ;;  %v1795_v17 = vtrunc.f32 %v992_v10  ;;  %v1266_v19 = vadd.f32 %v1265_v8, %v1264_v9  ;;  %v1267_v20 = vsel %vm1227_vm3, %v2206_v25, 0.0 }
 0x103   :  { %v990_v18 = vmin.f32 %v926_v11, 32767.0  ;;  %1182 = vst.msk [vmem:[%s2716_s2 + $0x4c] sm:$0xf] %vm1162_vm4, %v1117_v4  ;;  %v1383_v23 = vmul.f32 %v2206_v25, %v2206_v25  ;;  %v1465_v24 = vadd.f32 %v1464_v12, %v1463_v14  ;;  %v929_v27 = vmax.f32 %v2212_v35, -32768.0  ;;  %v491_v56 = vpop.f32.mrf.mxu0 }
 0x104   :  { %v1115_v60 = vpack.c.b16 %v1786_v13, %v1786_v13  ;;  %v1796_v28 = vcvt.f32.s32 %v1795_v17  ;;  %v1385_v22 = vmul.f32 %v2196_v15, %v2196_v15  ;;  %v1268_v30 = vadd.f32 %v1267_v20, %v1266_v19  ;;  %v2310_v19 = vpop.f32.mrf.mxu1 }
 0x105   :  { %v1791_v29 = vtrunc.f32 %v990_v18  ;;  %v1271_v31 = vsel %vm1227_vm3, %v2196_v15, 0.0  ;;  %v1466_v33 = vsel %vm1227_vm3, %v1383_v23, 0.0  ;;  %v993_v25 = vmin.f32 %v929_v27, 32767.0  ;;  %v1713_v12 = vpop.f32.mrf.mxu0 }
 0x106   :  { %1180 = vst.msk [vmem:[%s2716_s2 + $0x44] sm:$0xf] %vm1162_vm4, %v1115_v60  ;;  %v927_v34 = vmax.f32 %v2222_v45, -32768.0  ;;  %v1120_v37 = vpack.c.b16 %v1796_v28, %v1796_v28  ;;  %v1386_v39 = vmul.f32 %v2212_v35, %v2212_v35  ;;  %v1269_v40 = vsel %vm1227_vm3, %v2222_v45, 0.0 }
 0x107   :  { %v1792_v38 = vcvt.f32.s32 %v1791_v29  ;;  %v1467_v43 = vadd.f32 %v1466_v33, %v1465_v24  ;;  %v1797_v44 = vtrunc.f32 %v993_v25  ;;  %v1270_v47 = vadd.f32 %v1269_v40, %v1268_v30  ;;  %v504_v33 = vpop.f32.mrf.mxu0 }
 0x108   :  { %v991_v15 = vmin.f32 %v927_v34, 32767.0  ;;  %1185 = vst.msk [vmem:[%s2716_s2 + $0x58] sm:$0xf] %vm1162_vm4, %v1120_v37  ;;  %v1470_v48 = vsel %vm1227_vm3, %v1385_v22, 0.0  ;;  %v1384_v51 = vmul.f32 %v2222_v45, %v2222_v45  ;;  %v932_v50 = vmax.f32 %v2234_v59, -32768.0 }
 0x109   :  { %v1118_v49 = vpack.c.b16 %v1792_v38, %v1792_v38  ;;  %v1798_v53 = vcvt.f32.s32 %v1797_v44  ;;  %v1273_v41 = vsel %vm1227_vm3, %v2212_v35, 0.0  ;;  %v1272_v55 = vadd.f32 %v1271_v31, %v1270_v47 }
 0x10a   :  { %v1793_v54 = vtrunc.f32 %v991_v15  ;;  %v1472_v57 = vsel %vm1227_vm3, %v1386_v39, 0.0  ;;  %v1468_v58 = vsel %vm1227_vm3, %v1384_v51, 0.0  ;;  %v996_v61 = vmin.f32 %v932_v50, 32767.0  ;;  %v2325_v39 = vpop.f32.mrf.mxu1 }
 0x10b   :  { %1183 = vst.msk [vmem:[%s2716_s2 + $0x50] sm:$0xf] %vm1162_vm4, %v1118_v49  ;;  %v930_v45 = vmax.f32 %v488_v16, -32768.0  ;;  %v1121_v63 = vpack.c.b16 %v1798_v53, %v1798_v53  ;;  %v1469_v2 = vadd.f32 %v1468_v58, %v1467_v43  ;;  %v1279_v35 = vsel %vm1227_vm3, %v2234_v59, 0.0 }
 0x10c   :  { %v1794_v0 = vcvt.f32.s32 %v1793_v54  ;;  %v1803_v3 = vtrunc.f32 %v996_v61  ;;  %v1274_v6 = vadd.f32 %v1273_v41, %v1272_v55  ;;  %v1387_v8 = vmul.f32 %v488_v16, %v488_v16  ;;  %v1714_v61 = vpop.f32.mrf.mxu0 }
 0x10d   :  { %v994_v5 = vmin.f32 %v930_v45, 32767.0  ;;  %1186 = vst.msk [vmem:[%s2716_s2 + $0x5c] sm:$0xf] %vm1162_vm4, %v1121_v63  ;;  %v1471_v10 = vadd.f32 %v1470_v48, %v1469_v2  ;;  %v1275_v11 = vsel %vm1227_vm3, %v488_v16, 0.0  ;;  %v933_v4 = vmax.f32 %v2274_v36, -32768.0  ;;  %v2335_v45 = vpop.f32.mrf.mxu1 }
 0x10e   :  { %v1119_v9 = vpack.c.b16 %v1794_v0, %v1794_v0  ;;  %v1804_v13 = vcvt.f32.s32 %v1803_v3  ;;  %v1389_v14 = vmul.f32 %v2234_v59, %v2234_v59  ;;  %v1276_v18 = vadd.f32 %v1275_v11, %v1274_v6 }
 0x10f   :  { %v1799_v17 = vtrunc.f32 %v994_v5  ;;  %v1473_v20 = vadd.f32 %v1472_v57, %v1471_v10  ;;  %v1474_v60 = vsel %vm1227_vm3, %v1387_v8, 0.0  ;;  %v997_v16 = vmin.f32 %v933_v4, 32767.0 }
 0x110   :  { %1184 = vst.msk [vmem:[%s2716_s2 + $0x54] sm:$0xf] %vm1162_vm4, %v1119_v9  ;;  %v931_v23 = vmax.f32 %v491_v56, -32768.0  ;;  %v1124_v24 = vpack.c.b16 %v1804_v13, %v1804_v13  ;;  %v1277_v28 = vsel %vm1227_vm3, %v491_v56, 0.0  ;;  %v1388_v22 = vmul.f32 %v491_v56, %v491_v56 }
 0x111   :  { %v1800_v27 = vcvt.f32.s32 %v1799_v17  ;;  %v1475_v59 = vadd.f32 %v1474_v60, %v1473_v20  ;;  %v1805_v29 = vtrunc.f32 %v997_v16  ;;  %v1390_v30 = vmul.f32 %v2274_v36, %v2274_v36  ;;  %v507_v17 = vpop.f32.mrf.mxu0 }
 0x112   :  { %v995_v31 = vmin.f32 %v931_v23, 32767.0  ;;  %1189 = vst.msk [vmem:[%s2716_s2 + $0x68] sm:$0xf] %vm1162_vm4, %v1124_v24  ;;  %v1278_v34 = vadd.f32 %v1277_v28, %v1276_v18  ;;  %v1476_v37 = vsel %vm1227_vm3, %v1388_v22, 0.0  ;;  %v936_v38 = vmax.f32 %v1713_v12, -32768.0  ;;  %v2352_v18 = vpop.f32.mrf.mxu1 }
 0x113   :  { %v1122_v25 = vpack.c.b16 %v1800_v27, %v1800_v27  ;;  %v1478_v40 = vsel %vm1227_vm3, %v1389_v14, 0.0  ;;  %v1806_v43 = vcvt.f32.s32 %v1805_v29  ;;  %v1477_v15 = vadd.f32 %v1476_v37, %v1475_v59 }
 0x114   :  { %v1801_v44 = vtrunc.f32 %v995_v31  ;;  %v1281_v47 = vsel %vm1227_vm3, %v2274_v36, 0.0  ;;  %v1280_v48 = vadd.f32 %v1279_v35, %v1278_v34  ;;  %v1000_v49 = vmin.f32 %v936_v38, 32767.0  ;;  %v2374_v37 = vpop.f32.mrf.mxu1 }
 0x115   :  { %1187 = vst.msk [vmem:[%s2716_s2 + $0x60] sm:$0xf] %vm1162_vm4, %v1122_v25  ;;  %v934_v51 = vmax.f32 %v504_v33, -32768.0  ;;  %v1125_v50 = vpack.c.b16 %v1806_v43, %v1806_v43  ;;  %v1479_v41 = vadd.f32 %v1478_v40, %v1477_v15  ;;  %v1393_v54 = vmul.f32 %v1713_v12, %v1713_v12 }
 0x116   :  { %v1802_v53 = vcvt.f32.s32 %v1801_v44  ;;  %v1480_v55 = vsel %vm1227_vm3, %v1390_v30, 0.0  ;;  %v1811_v56 = vtrunc.f32 %v1000_v49  ;;  %v1282_v58 = vadd.f32 %v1281_v47, %v1280_v48 }
 0x117   :  { %v998_v57 = vmin.f32 %v934_v51, 32767.0  ;;  %1190 = vst.msk [vmem:[%s2716_s2 + $0x6c] sm:$0xf] %vm1162_vm4, %v1125_v50  ;;  %v1391_v63 = vmul.f32 %v504_v33, %v504_v33  ;;  %v1481_v0 = vadd.f32 %v1480_v55, %v1479_v41  ;;  %v940_v2 = vmax.f32 %v2155_v32, -32768.0 }
 0x118   :  { %v1123_v36 = vpack.c.b16 %v1802_v53, %v1802_v53  ;;  %v1812_v35 = vcvt.f32.s32 %v1811_v56  ;;  %v1287_v3 = vsel %vm1227_vm3, %v1713_v12, 0.0  ;;  %v1283_v6 = vsel %vm1227_vm3, %v504_v33, 0.0 }
 0x119   :  { %v1807_v5 = vtrunc.f32 %v998_v57  ;;  %v1486_v8 = vsel %vm1227_vm3, %v1393_v54, 0.0  ;;  %v1004_v9 = vmin.f32 %v940_v2, 32767.0  ;;  %v1397_v10 = vmul.f32 %v2155_v32, %v2155_v32 }
 0x11a   :  { %1188 = vst.msk [vmem:[%s2716_s2 + $0x64] sm:$0xf] %vm1162_vm4, %v1123_v36  ;;  %v937_v11 = vmax.f32 %v1714_v61, -32768.0  ;;  %v1128_v4 = vpack.c.b16 %v1812_v35, %v1812_v35  ;;  %v1284_v14 = vadd.f32 %v1283_v6, %v1282_v58  ;;  %v1482_v12 = vsel %vm1227_vm3, %v1391_v63, 0.0 }
 0x11b   :  { %v1808_v13 = vcvt.f32.s32 %v1807_v5  ;;  %v1483_v20 = vadd.f32 %v1482_v12, %v1481_v0  ;;  %v1819_v60 = vtrunc.f32 %v1004_v9  ;;  %v2356_v16 = vsel %vm1227_vm3, %v2155_v32, 0.0 }
 0x11c   :  { %v1001_v23 = vmin.f32 %v937_v11, 32767.0  ;;  %1193 = vst.msk [vmem:[%s2716_s2 + $0x78] sm:$0xf] %vm1162_vm4, %v1128_v4  ;;  %v2363_v27 = vsel %vm1227_vm3, %v1397_v10, 0.0  ;;  %v1289_v28 = vsel %vm1227_vm3, %v1714_v61, 0.0  ;;  %v1394_v30 = vmul.f32 %v1714_v61, %v1714_v61 }
 0x11d   :  { %v1126_v24 = vpack.c.b16 %v1808_v13, %v1808_v13  ;;  %v938_v22 = vmax.f32 %v2167_v52, -32768.0  ;;  %v1820_v59 = vcvt.f32.s32 %v1819_v60  ;;  %v935_v31 = vmax.f32 %v507_v17, -32768.0 }
 0x11e   :  { %v1813_v29 = vtrunc.f32 %v1001_v23  ;;  %v1395_v33 = vmul.f32 %v2167_v52, %v2167_v52  ;;  %v1285_v25 = vsel %vm1227_vm3, %v507_v17, 0.0  ;;  %v1392_v34 = vmul.f32 %v507_v17, %v507_v17 }
 0x11f   :  { %1191 = vst.msk [vmem:[%s2716_s2 + $0x70] sm:$0xf] %vm1162_vm4, %v1126_v24  ;;  %v1002_v32 = vmin.f32 %v938_v22, 32767.0  ;;  %v1132_v38 = vpack.c.b16 %v1820_v59, %v1820_v59  ;;  %v999_v43 = vmin.f32 %v935_v31, 32767.0  ;;  %v1286_v44 = vadd.f32 %v1285_v25, %v1284_v14 }
 0x120   :  { %v1814_v40 = vcvt.f32.s32 %v1813_v29  ;;  %v1291_v47 = vsel %vm1227_vm3, %v2167_v52, 0.0  ;;  %v1484_v48 = vsel %vm1227_vm3, %v1392_v34, 0.0  ;;  %v941_v49 = vmax.f32 %v2188_v7, -32768.0  ;;  %v2386_v52 = vpop.f32.mrf.mxu1 }
 0x121   :  { %v1815_v15 = vtrunc.f32 %v1002_v32  ;;  %1197 = vst.msk [vmem:[%s2716_s2 + $0x88] sm:$0xf] %vm1162_vm4, %v1132_v38  ;;  %v1809_v50 = vtrunc.f32 %v999_v43  ;;  %v1288_v53 = vadd.f32 %v1287_v3, %v1286_v44  ;;  %v1485_v41 = vadd.f32 %v1484_v48, %v1483_v20 }
 0x122   :  { %v1129_v51 = vpack.c.b16 %v1814_v40, %v1814_v40  ;;  %v1488_v54 = vsel %vm1227_vm3, %v1394_v30, 0.0  ;;  %v1005_v56 = vmin.f32 %v941_v49, 32767.0  ;;  %v939_v57 = vmax.f32 %v2208_v26, -32768.0  ;;  %v2404_v14 = vpop.f32.mrf.mxu1 }
 0x123   :  { %v1816_v55 = vcvt.f32.s32 %v1815_v15  ;;  %v1490_v58 = vsel %vm1227_vm3, %v1395_v33, 0.0  ;;  %v1810_v61 = vcvt.f32.s32 %v1809_v50  ;;  %v1290_v36 = vadd.f32 %v1289_v28, %v1288_v53 }
 0x124   :  { %1194 = vst.msk [vmem:[%s2716_s2 + $0x7c] sm:$0xf] %vm1162_vm4, %v1129_v51  ;;  %v1487_v63 = vadd.f32 %v1486_v8, %v1485_v41  ;;  %v1821_v2 = vtrunc.f32 %v1005_v56  ;;  %v1398_v35 = vmul.f32 %v2188_v7, %v2188_v7  ;;  %v1003_v3 = vmin.f32 %v939_v57, 32767.0  ;;  %v2424_v25 = vpop.f32.mrf.mxu1 }
 0x125   :  { %v1130_v0 = vpack.c.b16 %v1816_v55, %v1816_v55  ;;  %v1127_v5 = vpack.c.b16 %v1810_v61, %v1810_v61  ;;  %v1292_v9 = vadd.f32 %v1291_v47, %v1290_v36  ;;  %v1396_v10 = vmul.f32 %v2208_v26, %v2208_v26 }
 0x126   :  { %v1489_v6 = vadd.f32 %v1488_v54, %v1487_v63  ;;  %v1822_v11 = vcvt.f32.s32 %v1821_v2  ;;  %v1817_v4 = vtrunc.f32 %v1003_v3  ;;  %v1293_v8 = vsel %vm1227_vm3, %v2208_v26, 0.0  ;;  %v2442_v54 = vpop.f32.mrf.mxu1 }
 0x127   :  { %1195 = vst.msk [vmem:[%s2716_s2 + $0x80] sm:$0xf] %vm1162_vm4, %v1130_v0  ;;  %v944_v13 = vmax.f32 %v2224_v46, -32768.0  ;;  %1192 = vst.msk [vmem:[%s2716_s2 + $0x74] sm:$0xf] %vm1162_vm4, %v1127_v5  ;;  %v1297_v12 = vsel %vm1227_vm3, %v2188_v7, 0.0  ;;  %v1294_v17 = vadd.f32 %v1293_v8, %v1292_v9  ;;  %v1399_v33 = vmul.f32 %v2242_v1, %v2242_v1 }
 0x128   :  { %v1491_v20 = vadd.f32 %v1490_v58, %v1489_v6  ;;  %v1492_v60 = vsel %vm1227_vm3, %v1396_v10, 0.0  ;;  %v1133_v23 = vpack.c.b16 %v1822_v11, %v1822_v11  ;;  %v1818_v24 = vcvt.f32.s32 %v1817_v4  ;;  %v2461_v10 = vpop.f32.mrf.mxu1 }
 0x129   :  { %v1008_v28 = vmin.f32 %v944_v13, 32767.0  ;;  %v942_v26 = vmax.f32 %v2242_v1, -32768.0  ;;  %v1496_v22 = vsel %vm1227_vm3, %v1398_v35, 0.0  ;;  %v1296_v59 = vadd.f32 %v2356_v16, %v1294_v17 }
 0x12a   :  { %v1493_v29 = vadd.f32 %v1492_v60, %v1491_v20  ;;  %v1303_v30 = vsel %vm1227_vm3, %v2224_v46, 0.0  ;;  %1198 = vst.msk [vmem:[%s2716_s2 + $0x8c] sm:$0xf] %vm1162_vm4, %v1133_v23  ;;  %v1131_v7 = vpack.c.b16 %v1818_v24, %v1818_v24  ;;  %v1401_v16 = vmul.f32 %v2224_v46, %v2224_v46 }
 0x12b   :  { %v1827_v31 = vtrunc.f32 %v1008_v28  ;;  %v1006_v32 = vmin.f32 %v942_v26, 32767.0  ;;  %v1298_v38 = vadd.f32 %v1297_v12, %v1296_v59  ;;  %v945_v40 = vmax.f32 %v2255_v21, -32768.0 }
 0x12c   :  { %v1495_v34 = vadd.f32 %v2363_v27, %v1493_v29  ;;  %1196 = vst.msk [vmem:[%s2716_s2 + $0x84] sm:$0xf] %vm1162_vm4, %v1131_v7  ;;  %v1299_v15 = vsel %vm1227_vm3, %v2242_v1, 0.0  ;;  %v1498_v47 = vsel %vm1227_vm3, %v1399_v33, 0.0  ;;  %v943_v46 = vmax.f32 %v2280_v42, -32768.0 }
 0x12d   :  { %v1828_v43 = vcvt.f32.s32 %v1827_v31  ;;  %v1823_v44 = vtrunc.f32 %v1006_v32  ;;  %v1300_v48 = vadd.f32 %v1299_v15, %v1298_v38  ;;  %v1009_v49 = vmin.f32 %v945_v40, 32767.0 }
 0x12e   :  { %v1497_v27 = vadd.f32 %v1496_v22, %v1495_v34  ;;  %v1402_v53 = vmul.f32 %v2255_v21, %v2255_v21  ;;  %v1301_v41 = vsel %vm1227_vm3, %v2280_v42, 0.0  ;;  %v1007_v1 = vmin.f32 %v943_v46, 32767.0 }
 0x12f   :  { %v1136_v51 = vpack.c.b16 %v1828_v43, %v1828_v43  ;;  %v1824_v50 = vcvt.f32.s32 %v1823_v44  ;;  %v1829_v56 = vtrunc.f32 %v1009_v49  ;;  %v1302_v57 = vadd.f32 %v1301_v41, %v1300_v48 }
 0x130   :  { %v1499_v55 = vadd.f32 %v1498_v47, %v1497_v27  ;;  %v1502_v58 = vsel %vm1227_vm3, %v1401_v16, 0.0  ;;  %v1400_v36 = vmul.f32 %v2280_v42, %v2280_v42  ;;  %v948_v63 = vmax.f32 %v2298_v62, -32768.0 }
 0x131   :  { %1201 = vst.msk [vmem:[%s2716_s2 + $0x98] sm:$0xf] %vm1162_vm4, %v1136_v51  ;;  %v1134_v61 = vpack.c.b16 %v1824_v50, %v1824_v50  ;;  %v1830_v0 = vcvt.f32.s32 %v1829_v56  ;;  %v1305_v2 = vsel %vm1227_vm3, %v2255_v21, 0.0  ;;  %v1825_v35 = vtrunc.f32 %v1007_v1 }
 0x132   :  { %v1304_v3 = vadd.f32 %v1303_v30, %v1302_v57  ;;  %v1504_v5 = vsel %vm1227_vm3, %v1402_v53, 0.0  ;;  %v1500_v6 = vsel %vm1227_vm3, %v1400_v36, 0.0  ;;  %v1012_v9 = vmin.f32 %v948_v63, 32767.0  ;;  %v2476_v30 = vpop.f32.mrf.mxu1 }
 0x133   :  { %1199 = vst.msk [vmem:[%s2716_s2 + $0x90] sm:$0xf] %vm1162_vm4, %v1134_v61  ;;  %v946_v42 = vmax.f32 %v2310_v19, -32768.0  ;;  %v1137_v11 = vpack.c.b16 %v1830_v0, %v1830_v0  ;;  %v1826_v4 = vcvt.f32.s32 %v1825_v35  ;;  %v1501_v8 = vadd.f32 %v1500_v6, %v1499_v55 }
 0x134   :  { %v1311_v21 = vsel %vm1227_vm3, %v2298_v62, 0.0  ;;  %v1835_v13 = vtrunc.f32 %v1012_v9  ;;  %v1306_v17 = vadd.f32 %v1305_v2, %v1304_v3  ;;  %v1403_v20 = vmul.f32 %v2310_v19, %v2310_v19  ;;  %v2496_v49 = vpop.f32.mrf.mxu1 }
 0x135   :  { %v1010_v12 = vmin.f32 %v946_v42, 32767.0  ;;  %1202 = vst.msk [vmem:[%s2716_s2 + $0x9c] sm:$0xf] %vm1162_vm4, %v1137_v11  ;;  %v1135_v60 = vpack.c.b16 %v1826_v4, %v1826_v4  ;;  %v1503_v23 = vadd.f32 %v1502_v58, %v1501_v8  ;;  %v1307_v24 = vsel %vm1227_vm3, %v2310_v19, 0.0 }
 0x136   :  { %v949_v28 = vmax.f32 %v2325_v39, -32768.0  ;;  %v1836_v26 = vcvt.f32.s32 %v1835_v13  ;;  %v1405_v22 = vmul.f32 %v2298_v62, %v2298_v62  ;;  %v1308_v29 = vadd.f32 %v1307_v24, %v1306_v17  ;;  %v2509_v35 = vpop.f32.mrf.mxu1 }
 0x137   :  { %v1831_v59 = vtrunc.f32 %v1010_v12  ;;  %1200 = vst.msk [vmem:[%s2716_s2 + $0x94] sm:$0xf] %vm1162_vm4, %v1135_v60  ;;  %v1505_v7 = vadd.f32 %v1504_v5, %v1503_v23  ;;  %v1506_v31 = vsel %vm1227_vm3, %v1403_v20, 0.0  ;;  %v947_v19 = vmax.f32 %v2335_v45, -32768.0 }
 0x138   :  { %v1013_v32 = vmin.f32 %v949_v28, 32767.0  ;;  %v1140_v33 = vpack.c.b16 %v1836_v26, %v1836_v26  ;;  %v1406_v62 = vmul.f32 %v2325_v39, %v2325_v39  ;;  %v1404_v16 = vmul.f32 %v2335_v45, %v2335_v45  ;;  %v2532_v23 = vpop.f32.mrf.mxu1 }
 0x139   :  { %v1832_v34 = vcvt.f32.s32 %v1831_v59  ;;  %v1507_v38 = vadd.f32 %v1506_v31, %v1505_v7  ;;  %v1011_v43 = vmin.f32 %v947_v19, 32767.0  ;;  %v1309_v44 = vsel %vm1227_vm3, %v2335_v45, 0.0 }
 0x13a   :  { %v1837_v40 = vtrunc.f32 %v1013_v32  ;;  %1205 = vst.msk [vmem:[%s2716_s2 + $0xa8] sm:$0xf] %vm1162_vm4, %v1140_v33  ;;  %v1310_v47 = vadd.f32 %v1309_v44, %v1308_v29  ;;  %v1508_v48 = vsel %vm1227_vm3, %v1404_v16, 0.0  ;;  %v952_v27 = vmax.f32 %v2352_v18, -32768.0 }
 0x13b   :  { %v1138_v15 = vpack.c.b16 %v1832_v34, %v1832_v34  ;;  %v1510_v46 = vsel %vm1227_vm3, %v1405_v22, 0.0  ;;  %v1833_v50 = vtrunc.f32 %v1011_v43  ;;  %v1509_v53 = vadd.f32 %v1508_v48, %v1507_v38  ;;  %v2551_v38 = vpop.f32.mrf.mxu1 }
 0x13c   :  { %v1838_v51 = vcvt.f32.s32 %v1837_v40  ;;  %v1313_v45 = vsel %vm1227_vm3, %v2325_v39, 0.0  ;;  %v1312_v41 = vadd.f32 %v1311_v21, %v1310_v47  ;;  %v1016_v55 = vmin.f32 %v952_v27, 32767.0 }
 0x13d   :  { %1203 = vst.msk [vmem:[%s2716_s2 + $0xa0] sm:$0xf] %vm1162_vm4, %v1138_v15  ;;  %v950_v56 = vmax.f32 %v2374_v37, -32768.0  ;;  %v1512_v57 = vsel %vm1227_vm3, %v1406_v62, 0.0  ;;  %v1834_v58 = vcvt.f32.s32 %v1833_v50  ;;  %v1511_v61 = vadd.f32 %v1510_v46, %v1509_v53 }
 0x13e   :  { %v1141_v1 = vpack.c.b16 %v1838_v51, %v1838_v51  ;;  %v1843_v36 = vtrunc.f32 %v1016_v55  ;;  %v1314_v0 = vadd.f32 %v1313_v45, %v1312_v41  ;;  %v1315_v2 = vsel %vm1227_vm3, %v2374_v37, 0.0 }
 0x13f   :  { %v1014_v63 = vmin.f32 %v950_v56, 32767.0  ;;  %v1139_v39 = vpack.c.b16 %v1834_v58, %v1834_v58  ;;  %v1407_v3 = vmul.f32 %v2374_v37, %v2374_v37  ;;  %v1513_v5 = vadd.f32 %v1512_v57, %v1511_v61 }
 0x140   :  { %1206 = vst.msk [vmem:[%s2716_s2 + $0xac] sm:$0xf] %vm1162_vm4, %v1141_v1  ;;  %v953_v6 = vmax.f32 %v2386_v52, -32768.0  ;;  %v1844_v9 = vcvt.f32.s32 %v1843_v36  ;;  %v1409_v42 = vmul.f32 %v2352_v18, %v2352_v18  ;;  %v1316_v4 = vadd.f32 %v1315_v2, %v1314_v0  ;;  %v2566_v1 = vpop.f32.mrf.mxu1 }
 0x141   :  { %v1839_v11 = vtrunc.f32 %v1014_v63  ;;  %1204 = vst.msk [vmem:[%s2716_s2 + $0xa4] sm:$0xf] %vm1162_vm4, %v1139_v39  ;;  %v1319_v8 = vsel %vm1227_vm3, %v2352_v18, 0.0  ;;  %v1514_v21 = vsel %vm1227_vm3, %v1407_v3, 0.0  ;;  %v951_v13 = vmax.f32 %v2404_v14, -32768.0 }
 0x142   :  { %v1017_v37 = vmin.f32 %v953_v6, 32767.0  ;;  %v1144_v12 = vpack.c.b16 %v1844_v9, %v1844_v9  ;;  %v1410_v20 = vmul.f32 %v2386_v52, %v2386_v52  ;;  %v1317_v60 = vsel %vm1227_vm3, %v2404_v14, 0.0 }
 0x143   :  { %v1840_v17 = vcvt.f32.s32 %v1839_v11  ;;  %v1515_v24 = vadd.f32 %v1514_v21, %v1513_v5  ;;  %v1015_v26 = vmin.f32 %v951_v13, 32767.0  ;;  %v1318_v22 = vadd.f32 %v1317_v60, %v1316_v4  ;;  %v2586_v4 = vpop.f32.mrf.mxu1 }
 0x144   :  { %v1845_v28 = vtrunc.f32 %v1017_v37  ;;  %1209 = vst.msk [vmem:[%s2716_s2 + $0xb8] sm:$0xf] %vm1162_vm4, %v1144_v12  ;;  %v1518_v18 = vsel %vm1227_vm3, %v1409_v42, 0.0  ;;  %v1408_v29 = vmul.f32 %v2404_v14, %v2404_v14  ;;  %v956_v7 = vmax.f32 %v2424_v25, -32768.0 }
 0x145   :  { %v1142_v59 = vpack.c.b16 %v1840_v17, %v1840_v17  ;;  %v1321_v32 = vsel %vm1227_vm3, %v2386_v52, 0.0  ;;  %v1841_v19 = vtrunc.f32 %v1015_v26  ;;  %v1320_v33 = vadd.f32 %v1319_v8, %v1318_v22 }
 0x146   :  { %v1846_v31 = vcvt.f32.s32 %v1845_v28  ;;  %v1520_v34 = vsel %vm1227_vm3, %v1410_v20, 0.0  ;;  %v1516_v62 = vsel %vm1227_vm3, %v1408_v29, 0.0  ;;  %v1020_v16 = vmin.f32 %v956_v7, 32767.0  ;;  %v2599_v7 = vpop.f32.mrf.mxu1 }
 0x147   :  { %1207 = vst.msk [vmem:[%s2716_s2 + $0xb0] sm:$0xf] %vm1162_vm4, %v1142_v59  ;;  %v954_v14 = vmax.f32 %v2442_v54, -32768.0  ;;  %v1842_v43 = vcvt.f32.s32 %v1841_v19  ;;  %v1517_v44 = vadd.f32 %v1516_v62, %v1515_v24  ;;  %v1327_v52 = vsel %vm1227_vm3, %v2424_v25, 0.0 }
 0x148   :  { %v1145_v40 = vpack.c.b16 %v1846_v31, %v1846_v31  ;;  %v1851_v15 = vtrunc.f32 %v1020_v16  ;;  %v1322_v48 = vadd.f32 %v1321_v32, %v1320_v33  ;;  %v1411_v27 = vmul.f32 %v2442_v54, %v2442_v54 }
 0x149   :  { %v1018_v47 = vmin.f32 %v954_v14, 32767.0  ;;  %v1143_v46 = vpack.c.b16 %v1842_v43, %v1842_v43  ;;  %v1519_v51 = vadd.f32 %v1518_v18, %v1517_v44  ;;  %v1323_v50 = vsel %vm1227_vm3, %v2442_v54, 0.0 }
 0x14a   :  { %1210 = vst.msk [vmem:[%s2716_s2 + $0xbc] sm:$0xf] %vm1162_vm4, %v1145_v40  ;;  %v957_v53 = vmax.f32 %v2461_v10, -32768.0  ;;  %v1852_v45 = vcvt.f32.s32 %v1851_v15  ;;  %v1413_v41 = vmul.f32 %v2424_v25, %v2424_v25  ;;  %v1324_v56 = vadd.f32 %v1323_v50, %v1322_v48  ;;  %v619_v48 = vpop.f32.mrf.mxu1 }
 0x14b   :  { %v1847_v55 = vtrunc.f32 %v1018_v47  ;;  %1208 = vst.msk [vmem:[%s2716_s2 + $0xb4] sm:$0xf] %vm1162_vm4, %v1143_v46  ;;  %v1521_v57 = vadd.f32 %v1520_v34, %v1519_v51  ;;  %v1522_v58 = vsel %vm1227_vm3, %v1411_v27, 0.0  ;;  %v955_v54 = vmax.f32 %v2476_v30, -32768.0 }
 0x14c   :  { %v1021_v61 = vmin.f32 %v957_v53, 32767.0  ;;  %v1148_v36 = vpack.c.b16 %v1852_v45, %v1852_v45  ;;  %v1414_v25 = vmul.f32 %v2461_v10, %v2461_v10  ;;  %v1412_v0 = vmul.f32 %v2476_v30, %v2476_v30 }
 0x14d   :  { %v1848_v63 = vcvt.f32.s32 %v1847_v55  ;;  %v1523_v2 = vadd.f32 %v1522_v58, %v1521_v57  ;;  %v1019_v3 = vmin.f32 %v955_v54, 32767.0  ;;  %v1325_v5 = vsel %vm1227_vm3, %v2476_v30, 0.0 }
 0x14e   :  { %v1853_v39 = vtrunc.f32 %v1021_v61  ;;  %1213 = vst.msk [vmem:[%s2716_s2 + $0xc8] sm:$0xf] %vm1162_vm4, %v1148_v36  ;;  %v1326_v9 = vadd.f32 %v1325_v5, %v1324_v56  ;;  %v1524_v42 = vsel %vm1227_vm3, %v1412_v0, 0.0  ;;  %v960_v11 = vmax.f32 %v2496_v49, -32768.0 }
 0x14f   :  { %v1146_v6 = vpack.c.b16 %v1848_v63, %v1848_v63  ;;  %v1526_v8 = vsel %vm1227_vm3, %v1413_v41, 0.0  ;;  %v1849_v37 = vtrunc.f32 %v1019_v3  ;;  %v1525_v13 = vadd.f32 %v1524_v42, %v1523_v2  ;;  %v2639_v63 = vpop.f32.mrf.mxu1 }
 0x150   :  { %v1854_v21 = vcvt.f32.s32 %v1853_v39  ;;  %v1329_v30 = vsel %vm1227_vm3, %v2461_v10, 0.0  ;;  %v1328_v12 = vadd.f32 %v1327_v52, %v1326_v9  ;;  %v1024_v17 = vmin.f32 %v960_v11, 32767.0 }
 0x151   :  { %1211 = vst.msk [vmem:[%s2716_s2 + $0xc0] sm:$0xf] %vm1162_vm4, %v1146_v6  ;;  %v958_v20 = vmax.f32 %v2509_v35, -32768.0  ;;  %v1528_v24 = vsel %vm1227_vm3, %v1414_v25, 0.0  ;;  %v1850_v28 = vcvt.f32.s32 %v1849_v37  ;;  %v1527_v26 = vadd.f32 %v1526_v8, %v1525_v13 }
 0x152   :  { %v1149_v60 = vpack.c.b16 %v1854_v21, %v1854_v21  ;;  %v1859_v22 = vtrunc.f32 %v1024_v17  ;;  %v1330_v59 = vadd.f32 %v1329_v30, %v1328_v12  ;;  %v1331_v29 = vsel %vm1227_vm3, %v2509_v35, 0.0  ;;  %v632_v12 = vpop.f32.mrf.mxu1 }
 0x153   :  { %v1022_v18 = vmin.f32 %v958_v20, 32767.0  ;;  %v1147_v10 = vpack.c.b16 %v1850_v28, %v1850_v28  ;;  %v1415_v31 = vmul.f32 %v2509_v35, %v2509_v35  ;;  %v1529_v32 = vadd.f32 %v1528_v24, %v1527_v26 }
 0x154   :  { %1214 = vst.msk [vmem:[%s2716_s2 + $0xcc] sm:$0xf] %vm1162_vm4, %v1149_v60  ;;  %v961_v19 = vmax.f32 %v2532_v23, -32768.0  ;;  %v1860_v33 = vcvt.f32.s32 %v1859_v22  ;;  %v1417_v34 = vmul.f32 %v2496_v49, %v2496_v49  ;;  %v1332_v16 = vadd.f32 %v1331_v29, %v1330_v59 }
 0x155   :  { %v1855_v62 = vtrunc.f32 %v1022_v18  ;;  %1212 = vst.msk [vmem:[%s2716_s2 + $0xc4] sm:$0xf] %vm1162_vm4, %v1147_v10  ;;  %v1335_v14 = vsel %vm1227_vm3, %v2496_v49, 0.0  ;;  %v1530_v40 = vsel %vm1227_vm3, %v1415_v31, 0.0  ;;  %v959_v43 = vmax.f32 %v2551_v38, -32768.0 }
 0x156   :  { %v1025_v35 = vmin.f32 %v961_v19, 32767.0  ;;  %v1152_v44 = vpack.c.b16 %v1860_v33, %v1860_v33  ;;  %v1418_v15 = vmul.f32 %v2532_v23, %v2532_v23  ;;  %v1333_v47 = vsel %vm1227_vm3, %v2551_v38, 0.0  ;;  %v1746_v33 = vpop.f32.mrf.mxu1 }
 0x157   :  { %v1856_v52 = vcvt.f32.s32 %v1855_v62  ;;  %v1531_v27 = vadd.f32 %v1530_v40, %v1529_v32  ;;  %v1023_v51 = vmin.f32 %v959_v43, 32767.0  ;;  %v1334_v50 = vadd.f32 %v1333_v47, %v1332_v16 }
 0x158   :  { %v1861_v46 = vtrunc.f32 %v1025_v35  ;;  %1217 = vst.msk [vmem:[%s2716_s2 + $0xd8] sm:$0xf] %vm1162_vm4, %v1152_v44  ;;  %v1534_v49 = vsel %vm1227_vm3, %v1417_v34, 0.0  ;;  %v1416_v45 = vmul.f32 %v2551_v38, %v2551_v38  ;;  %v964_v41 = vmax.f32 %v2566_v1, -32768.0 }
 0x159   :  { %v1150_v53 = vpack.c.b16 %v1856_v52, %v1856_v52  ;;  %v1337_v56 = vsel %vm1227_vm3, %v2532_v23, 0.0  ;;  %v1857_v57 = vtrunc.f32 %v1023_v51  ;;  %v1336_v58 = vadd.f32 %v1335_v14, %v1334_v50 }
 0x15a   :  { %v1862_v55 = vcvt.f32.s32 %v1861_v46  ;;  %v1536_v61 = vsel %vm1227_vm3, %v1418_v15, 0.0  ;;  %v1532_v54 = vsel %vm1227_vm3, %v1416_v45, 0.0  ;;  %v1028_v36 = vmin.f32 %v964_v41, 32767.0 }
 0x15b   :  { %1215 = vst.msk [vmem:[%s2716_s2 + $0xd0] sm:$0xf] %vm1162_vm4, %v1150_v53  ;;  %v962_v38 = vmax.f32 %v2586_v4, -32768.0  ;;  %v1858_v0 = vcvt.f32.s32 %v1857_v57  ;;  %v1533_v2 = vadd.f32 %v1532_v54, %v1531_v27  ;;  %v1343_v23 = vsel %vm1227_vm3, %v2566_v1, 0.0 }
 0x15c   :  { %v1153_v25 = vpack.c.b16 %v1862_v55, %v1862_v55  ;;  %v1867_v39 = vtrunc.f32 %v1028_v36  ;;  %v1338_v5 = vadd.f32 %v1337_v56, %v1336_v58  ;;  %v1419_v6 = vmul.f32 %v2586_v4, %v2586_v4 }
 0x15d   :  { %v1026_v3 = vmin.f32 %v962_v38, 32767.0  ;;  %v1151_v9 = vpack.c.b16 %v1858_v0, %v1858_v0  ;;  %v1535_v42 = vadd.f32 %v1534_v49, %v1533_v2  ;;  %v1339_v11 = vsel %vm1227_vm3, %v2586_v4, 0.0  ;;  %v635_v49 = vpop.f32.mrf.mxu1 }
 0x15e   :  { %1218 = vst.msk [vmem:[%s2716_s2 + $0xdc] sm:$0xf] %vm1162_vm4, %v1153_v25  ;;  %v965_v8 = vmax.f32 %v2599_v7, -32768.0  ;;  %v1868_v21 = vcvt.f32.s32 %v1867_v39  ;;  %v1421_v37 = vmul.f32 %v2566_v1, %v2566_v1  ;;  %v1340_v30 = vadd.f32 %v1339_v11, %v1338_v5 }
 0x15f   :  { %v1863_v13 = vtrunc.f32 %v1026_v3  ;;  %1216 = vst.msk [vmem:[%s2716_s2 + $0xd4] sm:$0xf] %vm1162_vm4, %v1151_v9  ;;  %v1537_v17 = vadd.f32 %v1536_v61, %v1535_v42  ;;  %v1538_v20 = vsel %vm1227_vm3, %v1419_v6, 0.0  ;;  %v963_v24 = vmax.f32 %v619_v48, -32768.0 }
 0x160   :  { %v1029_v60 = vmin.f32 %v965_v8, 32767.0  ;;  %v1156_v4 = vpack.c.b16 %v1868_v21, %v1868_v21  ;;  %v1422_v26 = vmul.f32 %v2599_v7, %v2599_v7  ;;  %v1420_v22 = vmul.f32 %v619_v48, %v619_v48 }
 0x161   :  { %v1864_v28 = vcvt.f32.s32 %v1863_v13  ;;  %v1539_v1 = vadd.f32 %v1538_v20, %v1537_v17  ;;  %v1027_v59 = vmin.f32 %v963_v24, 32767.0  ;;  %v1341_v29 = vsel %vm1227_vm3, %v619_v48, 0.0 }
 0x162   :  { %v1869_v18 = vtrunc.f32 %v1029_v60  ;;  %1221 = vst.msk [vmem:[%s2716_s2 + $0xe8] sm:$0xf] %vm1162_vm4, %v1156_v4  ;;  %v1342_v31 = vadd.f32 %v1341_v29, %v1340_v30  ;;  %v1540_v32 = vsel %vm1227_vm3, %v1420_v22, 0.0  ;;  %v968_v19 = vmax.f32 %v2639_v63, -32768.0 }
 0x163   :  { %v1154_v10 = vpack.c.b16 %v1864_v28, %v1864_v28  ;;  %v1542_v34 = vsel %vm1227_vm3, %v1421_v37, 0.0  ;;  %v1865_v16 = vtrunc.f32 %v1027_v59  ;;  %v1541_v14 = vadd.f32 %v1540_v32, %v1539_v1 }
 0x164   :  { %v1870_v62 = vcvt.f32.s32 %v1869_v18  ;;  %v1345_v40 = vsel %vm1227_vm3, %v2599_v7, 0.0  ;;  %v1344_v35 = vadd.f32 %v1343_v23, %v1342_v31  ;;  %v1032_v43 = vmin.f32 %v968_v19, 32767.0 }
 0x165   :  { %1219 = vst.msk [vmem:[%s2716_s2 + $0xe0] sm:$0xf] %vm1162_vm4, %v1154_v10  ;;  %v966_v44 = vmax.f32 %v632_v12, -32768.0  ;;  %v1544_v15 = vsel %vm1227_vm3, %v1422_v26, 0.0  ;;  %v1866_v47 = vcvt.f32.s32 %v1865_v16  ;;  %v1543_v48 = vadd.f32 %v1542_v34, %v1541_v14 }
 0x166   :  { %v1157_v52 = vpack.c.b16 %v1870_v62, %v1870_v62  ;;  %v1875_v27 = vtrunc.f32 %v1032_v43  ;;  %v1346_v51 = vadd.f32 %v1345_v40, %v1344_v35  ;;  %v1347_v50 = vsel %vm1227_vm3, %v632_v12, 0.0 }
 0x167   :  { %v1030_v46 = vmin.f32 %v966_v44, 32767.0  ;;  %v1155_v7 = vpack.c.b16 %v1866_v47, %v1866_v47  ;;  %v1423_v53 = vmul.f32 %v632_v12, %v632_v12  ;;  %v1545_v45 = vadd.f32 %v1544_v15, %v1543_v48 }
 0x168   :  { %1222 = vst.msk [vmem:[%s2716_s2 + $0xec] sm:$0xf] %vm1162_vm4, %v1157_v52  ;;  %v969_v41 = vmax.f32 %v1746_v33, -32768.0  ;;  %v1876_v55 = vcvt.f32.s32 %v1875_v27  ;;  %v1348_v57 = vadd.f32 %v1347_v50, %v1346_v51  ;;  %v967_v61 = vmax.f32 %v635_v49, -32768.0 }
 0x169   :  { %v1871_v56 = vtrunc.f32 %v1030_v46  ;;  %1220 = vst.msk [vmem:[%s2716_s2 + $0xe4] sm:$0xf] %vm1162_vm4, %v1155_v7  ;;  %v1546_v38 = vsel %vm1227_vm3, %v1423_v53, 0.0  ;;  %v1349_v25 = vsel %vm1227_vm3, %v635_v49, 0.0  ;;  %v1351_v3 = vsel %vm1227_vm3, %v2639_v63, 0.0 }
 0x16a   :  { %v1033_v58 = vmin.f32 %v969_v41, 32767.0  ;;  %v1160_v54 = vpack.c.b16 %v1876_v55, %v1876_v55  ;;  %v1547_v0 = vadd.f32 %v1546_v38, %v1545_v45  ;;  %v1031_v23 = vmin.f32 %v967_v61, 32767.0 }
 0x16b   :  { %v1872_v36 = vcvt.f32.s32 %v1871_v56  ;;  %v1350_v39 = vadd.f32 %v1349_v25, %v1348_v57  ;;  %v1425_v5 = vmul.f32 %v2639_v63, %v2639_v63  ;;  %v1424_v9 = vmul.f32 %v635_v49, %v635_v49 }
 0x16c   :  { %v1877_v2 = vtrunc.f32 %v1033_v58  ;;  %1225 = vst.msk [vmem:[%s2716_s2 + $0xf8] sm:$0xf] %vm1162_vm4, %v1160_v54  ;;  %v1873_v11 = vtrunc.f32 %v1031_v23  ;;  %v1353_v21 = vsel %vm1227_vm3, %v1746_v33, 0.0  ;;  %v1426_v37 = vmul.f32 %v1746_v33, %v1746_v33 }
 0x16d   :  { %v1158_v6 = vpack.c.b16 %v1872_v36, %v1872_v36  ;;  %v1352_v8 = vadd.f32 %v1351_v3, %v1350_v39  ;;  %v1548_v13 = vsel %vm1227_vm3, %v1424_v9, 0.0  ;;  %v1550_v63 = vsel %vm1227_vm3, %v1425_v5, 0.0 }
 0x16e   :  { %v1878_v42 = vcvt.f32.s32 %v1877_v2  ;;  %v1874_v12 = vcvt.f32.s32 %v1873_v11  ;;  %v1549_v20 = vadd.f32 %v1548_v13, %v1547_v0  ;;  %v1552_v28 = vsel %vm1227_vm3, %v1426_v37, 0.0 }
 0x16f   :  { %1223 = vst.msk [vmem:[%s2716_s2 + $0xf0] sm:$0xf] %vm1162_vm4, %v1158_v6  ;;  %v1354_v17 = vadd.f32 %v1353_v21, %v1352_v8 }
 0x170   :  { %v1161_v30 = vpack.c.b16 %v1878_v42, %v1878_v42  ;;  %v1159_v60 = vpack.c.b16 %v1874_v12, %v1874_v12  ;;  %v1551_v4 = vadd.f32 %v1550_v63, %v1549_v20 }
 0x171   :  { %v1355_v24 = vrot.slane %v1354_v17, 4 }
 0x172   :  { %1226 = vst.msk [vmem:[%s2716_s2 + $0xfc] sm:$0xf] %vm1162_vm4, %v1161_v30  ;;  %1224 = vst.msk [vmem:[%s2716_s2 + $0xf4] sm:$0xf] %vm1162_vm4, %v1159_v60  ;;  %v1553_v22 = vadd.f32 %v1552_v28, %v1551_v4 }
 0x173   :  { %v1356_v26 = vadd.f32 %v1355_v24, %v1354_v17 }
 0x174   :  { %v1554_v1 = vrot.slane %v1553_v22, 4 }
 0x175   :  { %v1357_v18 = vrot.slane %v1356_v26, 2 }
 0x176   :  { %v1555_v29 = vadd.f32 %v1554_v1, %v1553_v22 }
 0x177   :  { %v1358_v59 = vadd.f32 %v1357_v18, %v1356_v26 }
 0x178   :  { %v1556_v31 = vrot.slane %v1555_v29, 2 }
 0x179   :  { %v1359_v10 = vrot.slane %v1358_v59, 1 }
 0x17a   :  { %v1557_v19 = vadd.f32 %v1556_v31, %v1555_v29 }
 0x17b   :  { %v1360_v32 = vadd.f32 %v1359_v10, %v1358_v59 }
 0x17c   :  { %v1558_v33 = vrot.slane %v1557_v19, 1 }
 0x17d   :  { %1362 = vst.msk [vmem:[#allocation2] sm:$0x1] %vm1361_vm5, %v1360_v32 }
 0x17e   :  { %v1559_v34 = vadd.f32 %v1558_v33, %v1557_v19 }
 0x180   :  { %1560 = vst.msk [vmem:[#allocation2 + $0x1] sm:$0x1] %vm1361_vm5, %v1559_v34 }
 0x181   :  { %1926 = shalt.err (!%p1923_p4)
}
 0x182   :  { %1572 = dma.vmem_to_hbm [thread:$0]  %s1570_s8, 32, %s2717_s3, [#allocation3]  }
 0x183   :  { %1935 = dma.done.wait [#allocation3], 32  }
 0x184   :  { %1936 = vsyncadd [#allocation3], 4294967264 }
 0x185   :  { %1578 = vsyncpa [#allocation3], 1 }

</bundles_post_ra>
